<compile_context>
chip_gen: v5e
topology: v5e:2x2
jax: 0.10.0
libtpu: 0.0.40
codegen_flags: <defaults>
</compile_context>

<pallas_src>
import jax
import jax.numpy as jnp
import numpy as np
from jax.experimental import pallas as pl
from jax.experimental.pallas import tpu as pltpu

# Small stand-in dimensions (orig: H=1024, E=300, V=len(embedding.vectors))
B = 8        # batch
S = 16       # encoder max_length
H = 128      # attention / GRU hidden size
E = 64       # embedding dim
V = 256      # vocab size
TILE_V = 128 # vocab tile (at real sizes: 512-2048, capped by per-generation VMEM)

VMEM_LIMIT = 64 * 1024 * 1024


# ----------------------------------------------------------------------------
# Kernel 1: attention + single-step GRU (everything small, single block)
# ----------------------------------------------------------------------------
def attn_gru_kernel(embed_ref, hid_ref, eo_ref, maskb_ref,
                    wah_ref, wae_ref, ba_ref, va_ref,
                    wie_ref, wic_ref, whh_ref, bih_ref, bhh_ref,
                    ctx_ref, hnew_ref):
    embed = embed_ref[...]                  # (B, E)  f32
    h = hid_ref[...]                        # (B, H)  f32
    eo = eo_ref[...]                        # (B, S, H) f32
    mb = maskb_ref[...]                     # (B, S)  f32 additive mask bias (0 / -1e10)
    b, s, hdim = eo.shape

    h_bf = h.astype(jnp.bfloat16)

    # ---- Attention: energy = tanh([hidden_rep ; e_output] @ W_att^T + b_att) ----
    hp = jnp.dot(h_bf, wah_ref[...], preferred_element_type=jnp.float32)          # (B, H)
    eo2 = eo.reshape(b * s, hdim).astype(jnp.bfloat16)
    ep = jnp.dot(eo2, wae_ref[...], preferred_element_type=jnp.float32).reshape(b, s, hdim)
    energy = jnp.tanh(hp[:, None, :] + ep + ba_ref[...][None, :, :])              # (B, S, H)

    # attention scores: energy @ v^T (lane reduce over H; XLU has slack here)
    score = jnp.sum(energy * va_ref[...][None, :, :], axis=2) + mb                # (B, S)
    # softmax over the sequence dim
    score = score - jnp.max(score, axis=1, keepdims=True)
    p = jnp.exp(score)
    a = p / jnp.sum(p, axis=1, keepdims=True)                                     # (B, S)

    # context vector = bmm(a, e_output) on the MXU
    ctx = jnp.einsum('bqs,bsh->bqh', a[:, None, :], eo,
                     preferred_element_type=jnp.float32).reshape(b, hdim)         # (B, H)

    # ---- Single-step GRU (PyTorch gate order: r, z, n) ----
    gi = (jnp.dot(embed.astype(jnp.bfloat16), wie_ref[...],
                  preferred_element_type=jnp.float32)
          + jnp.dot(ctx.astype(jnp.bfloat16), wic_ref[...],
                    preferred_element_type=jnp.float32)
          + bih_ref[...])                                                          # (B, 3H)
    gh = jnp.dot(h_bf, whh_ref[...], preferred_element_type=jnp.float32) + bhh_ref[...]
    r = jax.nn.sigmoid(gi[:, :hdim] + gh[:, :hdim])
    z = jax.nn.sigmoid(gi[:, hdim:2 * hdim] + gh[:, hdim:2 * hdim])
    n = jnp.tanh(gi[:, 2 * hdim:] + r * gh[:, 2 * hdim:])
    hnew = (1.0 - z) * n + z * h                                                   # (B, H)

    ctx_ref[...] = ctx
    hnew_ref[...] = hnew


# ----------------------------------------------------------------------------
# Kernel 2: output projection, tiled over the vocab dimension (parallel grid)
# ----------------------------------------------------------------------------
def outproj_kernel(embed_ref, hnew_ref, ctx_ref,
                   woe_ref, woh_ref, woc_ref, bo_ref,
                   pred_ref):
    embed = embed_ref[...].astype(jnp.bfloat16)    # (B, E)
    hnew = hnew_ref[...].astype(jnp.bfloat16)      # (B, H)
    ctx = ctx_ref[...].astype(jnp.bfloat16)        # (B, H)
    pred_ref[...] = (jnp.dot(embed, woe_ref[...], preferred_element_type=jnp.float32)
                     + jnp.dot(hnew, woh_ref[...], preferred_element_type=jnp.float32)
                     + jnp.dot(ctx, woc_ref[...], preferred_element_type=jnp.float32)
                     + bo_ref[...])                                                # (B, TILE_V)


def _full_spec(shape):
    # Whole array as a single block (block index constant across the grid).
    n = len(shape)
    return pl.BlockSpec(shape, lambda *_, _n=n: (0,) * _n)


# ----------------------------------------------------------------------------
# One-time weight preparation (split / transpose / bf16 cast done ONCE, not per step)
# ----------------------------------------------------------------------------
def prepare_params(params):
    w_att = params['att_w']      # (H, 2H)
    w_ih = params['gru_w_ih']    # (3H, E+H)
    w_out = params['out_w']      # (V, E+2H)
    bf = jnp.bfloat16
    pp = {
        'embedding': params['embedding'],                       # (V, E) f32
        'wah': jnp.asarray(w_att[:, :H].T, bf),                 # (H, H)
        'wae': jnp.asarray(w_att[:, H:].T, bf),                 # (H, H)
        'ba':  params['att_b'].reshape(1, H),
        'va':  params['att_v'].reshape(1, H),
        'wie': jnp.asarray(w_ih[:, :E].T, bf),                  # (E, 3H)
        'wic': jnp.asarray(w_ih[:, E:].T, bf),                  # (H, 3H)
        'whh': jnp.asarray(params['gru_w_hh'].T, bf),           # (H, 3H)
        'bih': params['gru_b_ih'].reshape(1, 3 * H),
        'bhh': params['gru_b_hh'].reshape(1, 3 * H),
        'woe': jnp.asarray(w_out[:, :E].T, bf),                 # (E, V)
        'woh': jnp.asarray(w_out[:, E:E + H].T, bf),            # (H, V)
        'woc': jnp.asarray(w_out[:, E + H:].T, bf),             # (H, V)
        'bo':  params['out_b'].reshape(1, V),
    }
    return jax.tree_util.tree_map(jnp.asarray, pp)


# ----------------------------------------------------------------------------
# Forward (single decode step)
# ----------------------------------------------------------------------------
@jax.jit
def decoder_forward(inputs, hidden, e_output, mask, pp):
    embed = pp['embedding'][inputs]                                  # (B, E) f32
    mask_bias = jnp.where(mask, 0.0, -1e10).astype(jnp.float32)      # (B, S)

    # ---- attention + GRU (single block) ----
    args_a = (embed, hidden, e_output, mask_bias,
              pp['wah'], pp['wae'], pp['ba'], pp['va'],
              pp['wie'], pp['wic'], pp['whh'], pp['bih'], pp['bhh'])
    ctx, hnew = pl.pallas_call(
        attn_gru_kernel,
        grid=(1,),
        in_specs=[_full_spec(a.shape) for a in args_a],
        out_specs=(_full_spec((B, H)), _full_spec((B, H))),
        out_shape=(jax.ShapeDtypeStruct((B, H), jnp.float32),
                   jax.ShapeDtypeStruct((B, H), jnp.float32)),
        compiler_params=pltpu.CompilerParams(
            dimension_semantics=("arbitrary",),
            vmem_limit_bytes=VMEM_LIMIT),
    )(*args_a)

    # ---- output projection: stream bf16 weight tiles over the vocab dim ----
    nv = V // TILE_V
    pred = pl.pallas_call(
        outproj_kernel,
        grid=(nv,),
        in_specs=[
            pl.BlockSpec((B, E), lambda j: (0, 0)),          # embed   (resident)
            pl.BlockSpec((B, H), lambda j: (0, 0)),          # hnew    (resident)
            pl.BlockSpec((B, H), lambda j: (0, 0)),          # ctx     (resident)
            pl.BlockSpec((E, TILE_V), lambda j: (0, j)),     # woe tile (streamed)
            pl.BlockSpec((H, TILE_V), lambda j: (0, j)),     # woh tile (streamed)
            pl.BlockSpec((H, TILE_V), lambda j: (0, j)),     # woc tile (streamed)
            pl.BlockSpec((1, TILE_V), lambda j: (0, j)),     # bias tile
        ],
        out_specs=pl.BlockSpec((B, TILE_V), lambda j: (0, j)),
        out_shape=jax.ShapeDtypeStruct((B, V), jnp.float32),
        compiler_params=pltpu.CompilerParams(
            dimension_semantics=("parallel",),               # shard V tiles across TCs
            vmem_limit_bytes=VMEM_LIMIT),
    )(embed, hnew, ctx, pp['woe'], pp['woh'], pp['woc'], pp['bo'])

    return pred, hnew


# ----------------------------------------------------------------------------
# Pure-JAX f32 mirror of the PyTorch Decoder.forward (eval mode) for checking
# ----------------------------------------------------------------------------
def reference_forward(inputs, hidden, e_output, mask, params):
    embed = params['embedding'][inputs]
    hrep = jnp.repeat(hidden[:, None, :], S, axis=1)
    cat = jnp.concatenate([hrep, e_output], axis=2)
    energy = jnp.tanh(cat @ params['att_w'].T + params['att_b'])
    att = (energy @ params['att_v'].T)[..., 0]
    att = jnp.where(mask, att, -1e10)
    a = jax.nn.softmax(att, axis=1)
    ctx = jnp.einsum('bs,bsh->bh', a, e_output)
    x = jnp.concatenate([embed, ctx], axis=1)
    gi = x @ params['gru_w_ih'].T + params['gru_b_ih']
    gh = hidden @ params['gru_w_hh'].T + params['gru_b_hh']
    r = jax.nn.sigmoid(gi[:, :H] + gh[:, :H])
    z = jax.nn.sigmoid(gi[:, H:2 * H] + gh[:, H:2 * H])
    n = jnp.tanh(gi[:, 2 * H:] + r * gh[:, 2 * H:])
    hnew = (1.0 - z) * n + z * hidden
    pred = jnp.concatenate([embed, hnew, ctx], axis=1) @ params['out_w'].T + params['out_b']
    return pred, hnew


if __name__ == "__main__":
    key = jax.random.PRNGKey(0)
    ks = jax.random.split(key, 16)
    sc = 0.05
    params = {
        'embedding': jax.random.normal(ks[0], (V, E), jnp.float32) * sc,
        'att_w':     jax.random.normal(ks[1], (H, 2 * H), jnp.float32) * sc,
        'att_b':     jax.random.normal(ks[2], (H,), jnp.float32) * sc,
        'att_v':     jax.random.normal(ks[3], (1, H), jnp.float32) * sc,
        'gru_w_ih':  jax.random.normal(ks[4], (3 * H, E + H), jnp.float32) * sc,
        'gru_w_hh':  jax.random.normal(ks[5], (3 * H, H), jnp.float32) * sc,
        'gru_b_ih':  jax.random.normal(ks[6], (3 * H,), jnp.float32) * sc,
        'gru_b_hh':  jax.random.normal(ks[7], (3 * H,), jnp.float32) * sc,
        'out_w':     jax.random.normal(ks[8], (V, E + 2 * H), jnp.float32) * sc,
        'out_b':     jax.random.normal(ks[9], (V,), jnp.float32) * sc,
    }
    inputs = jax.random.randint(ks[10], (B,), 0, V)                     # decoder token ids
    hidden = jax.random.normal(ks[11], (B, H), jnp.float32)             # previous hidden
    e_output = jax.random.normal(ks[12], (B, S, H), jnp.float32)        # encoder outputs
    lengths = jax.random.randint(ks[13], (B,), 1, S + 1)
    mask = jnp.arange(S)[None, :] < lengths[:, None]                    # (B, S) bool

    pp = prepare_params(params)   # one-time weight split / transpose / bf16 cast

    pred, hnew = decoder_forward(inputs, hidden, e_output, mask, pp)
    jax.block_until_ready((pred, hnew))

    pred_ref, hnew_ref = reference_forward(inputs, hidden, e_output, mask, params)
    assert pred.shape == (B, V) and hnew.shape == (B, H)
    # bf16 weights -> looser tolerance than the pure-f32 reference
    assert np.allclose(np.asarray(pred), np.asarray(pred_ref), atol=3e-2, rtol=3e-2)
    assert np.allclose(np.asarray(hnew), np.asarray(hnew_ref), atol=3e-2, rtol=3e-2)
    print("KERNEL_OK")
</pallas_src>

<mosaic_0001>
module attributes {stable_mosaic.version = 11 : i64} {
  func.func @outproj_kernel(%arg0: i32, %arg1: memref<8x64xf32, #tpu.memory_space<vmem>>, %arg2: memref<8x128xf32, #tpu.memory_space<vmem>>, %arg3: memref<8x128xf32, #tpu.memory_space<vmem>>, %arg4: memref<64x128xbf16, #tpu.memory_space<vmem>>, %arg5: memref<128x128xbf16, #tpu.memory_space<vmem>>, %arg6: memref<128x128xbf16, #tpu.memory_space<vmem>>, %arg7: memref<1x128xf32, #tpu.memory_space<vmem>>, %arg8: memref<8x128xf32, #tpu.memory_space<vmem>>) attributes {dimension_semantics = [#tpu.dimension_semantics<parallel>], iteration_bounds = array<i64: 2>, scalar_prefetch = 0 : i64, scratch_operands = 0 : i64, tpu.core_type = #tpu.core_type<tc>, window_params = [{pipeline_mode = #tpu.pipeline_mode<synchronous>, transform_indices = @transform_0, window_bounds = array<i64: 8, 64>}, {pipeline_mode = #tpu.pipeline_mode<synchronous>, transform_indices = @transform_1, window_bounds = array<i64: 8, 128>}, {pipeline_mode = #tpu.pipeline_mode<synchronous>, transform_indices = @transform_2, window_bounds = array<i64: 8, 128>}, {transform_indices = @transform_3, window_bounds = array<i64: 64, 128>}, {transform_indices = @transform_4, window_bounds = array<i64: 128, 128>}, {transform_indices = @transform_5, window_bounds = array<i64: 128, 128>}, {transform_indices = @transform_6, window_bounds = array<i64: 1, 128>}, {transform_indices = @transform_7, window_bounds = array<i64: 8, 128>}]} {
    %c0 = arith.constant 0 : index
    %c0_0 = arith.constant 0 : index
    %0 = vector.load %arg1[%c0, %c0_0] : memref<8x64xf32, #tpu.memory_space<vmem>>, vector<8x64xf32>
    %1 = arith.truncf %0 : vector<8x64xf32> to vector<8x64xbf16>
    %c0_1 = arith.constant 0 : index
    %c0_2 = arith.constant 0 : index
    %2 = vector.load %arg2[%c0_1, %c0_2] : memref<8x128xf32, #tpu.memory_space<vmem>>, vector<8x128xf32>
    %3 = arith.truncf %2 : vector<8x128xf32> to vector<8x128xbf16>
    %c0_3 = arith.constant 0 : index
    %c0_4 = arith.constant 0 : index
    %4 = vector.load %arg3[%c0_3, %c0_4] : memref<8x128xf32, #tpu.memory_space<vmem>>, vector<8x128xf32>
    %5 = arith.truncf %4 : vector<8x128xf32> to vector<8x128xbf16>
    %c0_5 = arith.constant 0 : index
    %c0_6 = arith.constant 0 : index
    %6 = vector.load %arg4[%c0_5, %c0_6] : memref<64x128xbf16, #tpu.memory_space<vmem>>, vector<64x128xbf16>
    %cst = arith.constant dense<0.000000e+00> : vector<8x128xf32>
    %7 = tpu.matmul %1, %6, %cst {dimension_numbers = #tpu.dot_dimension_numbers<[1], [0], [0], [1], [0, 0, 1, 1], [], []>} : vector<8x64xbf16>, vector<64x128xbf16>, vector<8x128xf32> -> vector<8x128xf32>
    %c0_7 = arith.constant 0 : index
    %c0_8 = arith.constant 0 : index
    %8 = vector.load %arg5[%c0_7, %c0_8] : memref<128x128xbf16, #tpu.memory_space<vmem>>, vector<128x128xbf16>
    %cst_9 = arith.constant dense<0.000000e+00> : vector<8x128xf32>
    %9 = tpu.matmul %3, %8, %cst_9 {dimension_numbers = #tpu.dot_dimension_numbers<[1], [0], [0], [1], [0, 0, 1, 1], [], []>} : vector<8x128xbf16>, vector<128x128xbf16>, vector<8x128xf32> -> vector<8x128xf32>
    %10 = arith.addf %7, %9 : vector<8x128xf32>
    %c0_10 = arith.constant 0 : index
    %c0_11 = arith.constant 0 : index
    %11 = vector.load %arg6[%c0_10, %c0_11] : memref<128x128xbf16, #tpu.memory_space<vmem>>, vector<128x128xbf16>
    %cst_12 = arith.constant dense<0.000000e+00> : vector<8x128xf32>
    %12 = tpu.matmul %5, %11, %cst_12 {dimension_numbers = #tpu.dot_dimension_numbers<[1], [0], [0], [1], [0, 0, 1, 1], [], []>} : vector<8x128xbf16>, vector<128x128xbf16>, vector<8x128xf32> -> vector<8x128xf32>
    %13 = arith.addf %10, %12 : vector<8x128xf32>
    %c0_13 = arith.constant 0 : index
    %c0_14 = arith.constant 0 : index
    %14 = vector.load %arg7[%c0_13, %c0_14] : memref<1x128xf32, #tpu.memory_space<vmem>>, vector<1x128xf32>
    %15 = vector.broadcast %14 : vector<1x128xf32> to vector<8x128xf32>
    %16 = arith.addf %13, %15 : vector<8x128xf32>
    %c0_15 = arith.constant 0 : index
    %c0_16 = arith.constant 0 : index
    %17 = vector.load %arg8[%c0_15, %c0_16] : memref<8x128xf32, #tpu.memory_space<vmem>>, vector<8x128xf32>
    tpu.vector_store %arg8[%c0_15, %c0_16], %16 {strides = array<i32>} : memref<8x128xf32, #tpu.memory_space<vmem>>, vector<8x128xf32>,
    return
  }
  func.func @transform_0(%arg0: i32) -> (i32, i32) {
    %c0_i32 = arith.constant 0 : i32
    %c0_i32_0 = arith.constant 0 : i32
    %c0_i32_1 = arith.constant 0 : i32
    return %c0_i32, %c0_i32_0 : i32, i32
  }
  func.func @transform_1(%arg0: i32) -> (i32, i32) {
    %c0_i32 = arith.constant 0 : i32
    %c0_i32_0 = arith.constant 0 : i32
    %c0_i32_1 = arith.constant 0 : i32
    return %c0_i32, %c0_i32_0 : i32, i32
  }
  func.func @transform_2(%arg0: i32) -> (i32, i32) {
    %c0_i32 = arith.constant 0 : i32
    %c0_i32_0 = arith.constant 0 : i32
    %c0_i32_1 = arith.constant 0 : i32
    return %c0_i32, %c0_i32_0 : i32, i32
  }
  func.func @transform_3(%arg0: i32) -> (i32, i32) {
    %c0_i32 = arith.constant 0 : i32
    %c0_i32_0 = arith.constant 0 : i32
    return %c0_i32, %arg0 : i32, i32
  }
  func.func @transform_4(%arg0: i32) -> (i32, i32) {
    %c0_i32 = arith.constant 0 : i32
    %c0_i32_0 = arith.constant 0 : i32
    return %c0_i32, %arg0 : i32, i32
  }
  func.func @transform_5(%arg0: i32) -> (i32, i32) {
    %c0_i32 = arith.constant 0 : i32
    %c0_i32_0 = arith.constant 0 : i32
    return %c0_i32, %arg0 : i32, i32
  }
  func.func @transform_6(%arg0: i32) -> (i32, i32) {
    %c0_i32 = arith.constant 0 : i32
    %c0_i32_0 = arith.constant 0 : i32
    return %c0_i32, %arg0 : i32, i32
  }
  func.func @transform_7(%arg0: i32) -> (i32, i32) {
    %c0_i32 = arith.constant 0 : i32
    %c0_i32_0 = arith.constant 0 : i32
    return %c0_i32, %arg0 : i32, i32
  }
}

module attributes {stable_mosaic.version = 11 : i64} {
  func.func @attn_gru_kernel(%arg0: i32, %arg1: memref<8x64xf32, #tpu.memory_space<vmem>>, %arg2: memref<8x128xf32, #tpu.memory_space<vmem>>, %arg3: memref<8x16x128xf32, #tpu.memory_space<vmem>>, %arg4: memref<8x16xf32, #tpu.memory_space<vmem>>, %arg5: memref<128x128xbf16, #tpu.memory_space<vmem>>, %arg6: memref<128x128xbf16, #tpu.memory_space<vmem>>, %arg7: memref<1x128xf32, #tpu.memory_space<vmem>>, %arg8: memref<1x128xf32, #tpu.memory_space<vmem>>, %arg9: memref<64x384xbf16, #tpu.memory_space<vmem>>, %arg10: memref<128x384xbf16, #tpu.memory_space<vmem>>, %arg11: memref<128x384xbf16, #tpu.memory_space<vmem>>, %arg12: memref<1x384xf32, #tpu.memory_space<vmem>>, %arg13: memref<1x384xf32, #tpu.memory_space<vmem>>, %arg14: memref<8x128xf32, #tpu.memory_space<vmem>>, %arg15: memref<8x128xf32, #tpu.memory_space<vmem>>) attributes {dimension_semantics = [#tpu.dimension_semantics<arbitrary>], iteration_bounds = array<i64: 1>, scalar_prefetch = 0 : i64, scratch_operands = 0 : i64, tpu.core_type = #tpu.core_type<tc>, window_params = [{pipeline_mode = #tpu.pipeline_mode<synchronous>, transform_indices = @transform_0, window_bounds = array<i64: 8, 64>}, {pipeline_mode = #tpu.pipeline_mode<synchronous>, transform_indices = @transform_1, window_bounds = array<i64: 8, 128>}, {pipeline_mode = #tpu.pipeline_mode<synchronous>, transform_indices = @transform_2, window_bounds = array<i64: 8, 16, 128>}, {pipeline_mode = #tpu.pipeline_mode<synchronous>, transform_indices = @transform_3, window_bounds = array<i64: 8, 16>}, {pipeline_mode = #tpu.pipeline_mode<synchronous>, transform_indices = @transform_4, window_bounds = array<i64: 128, 128>}, {pipeline_mode = #tpu.pipeline_mode<synchronous>, transform_indices = @transform_5, window_bounds = array<i64: 128, 128>}, {pipeline_mode = #tpu.pipeline_mode<synchronous>, transform_indices = @transform_6, window_bounds = array<i64: 1, 128>}, {pipeline_mode = #tpu.pipeline_mode<synchronous>, transform_indices = @transform_7, window_bounds = array<i64: 1, 128>}, {pipeline_mode = #tpu.pipeline_mode<synchronous>, transform_indices = @transform_8, window_bounds = array<i64: 64, 384>}, {pipeline_mode = #tpu.pipeline_mode<synchronous>, transform_indices = @transform_9, window_bounds = array<i64: 128, 384>}, {pipeline_mode = #tpu.pipeline_mode<synchronous>, transform_indices = @transform_10, window_bounds = array<i64: 128, 384>}, {pipeline_mode = #tpu.pipeline_mode<synchronous>, transform_indices = @transform_11, window_bounds = array<i64: 1, 384>}, {pipeline_mode = #tpu.pipeline_mode<synchronous>, transform_indices = @transform_12, window_bounds = array<i64: 1, 384>}, {pipeline_mode = #tpu.pipeline_mode<synchronous>, transform_indices = @transform_13, window_bounds = array<i64: 8, 128>}, {pipeline_mode = #tpu.pipeline_mode<synchronous>, transform_indices = @transform_14, window_bounds = array<i64: 8, 128>}]} {
    %c0 = arith.constant 0 : index
    %c0_0 = arith.constant 0 : index
    %0 = vector.load %arg1[%c0, %c0_0] : memref<8x64xf32, #tpu.memory_space<vmem>>, vector<8x64xf32>
    %c0_1 = arith.constant 0 : index
    %c0_2 = arith.constant 0 : index
    %1 = vector.load %arg2[%c0_1, %c0_2] : memref<8x128xf32, #tpu.memory_space<vmem>>, vector<8x128xf32>
    %c0_3 = arith.constant 0 : index
    %c0_4 = arith.constant 0 : index
    %c0_5 = arith.constant 0 : index
    %2 = vector.load %arg3[%c0_3, %c0_4, %c0_5] : memref<8x16x128xf32, #tpu.memory_space<vmem>>, vector<8x16x128xf32>
    %c0_6 = arith.constant 0 : index
    %c0_7 = arith.constant 0 : index
    %3 = vector.load %arg4[%c0_6, %c0_7] : memref<8x16xf32, #tpu.memory_space<vmem>>, vector<8x16xf32>
    %4 = arith.truncf %1 : vector<8x128xf32> to vector<8x128xbf16>
    %c0_8 = arith.constant 0 : index
    %c0_9 = arith.constant 0 : index
    %5 = vector.load %arg5[%c0_8, %c0_9] : memref<128x128xbf16, #tpu.memory_space<vmem>>, vector<128x128xbf16>
    %cst = arith.constant dense<0.000000e+00> : vector<8x128xf32>
    %6 = tpu.matmul %4, %5, %cst {dimension_numbers = #tpu.dot_dimension_numbers<[1], [0], [0], [1], [0, 0, 1, 1], [], []>} : vector<8x128xbf16>, vector<128x128xbf16>, vector<8x128xf32> -> vector<8x128xf32>
    %7 = vector.shape_cast %2 : vector<8x16x128xf32> to vector<128x128xf32>
    %8 = arith.truncf %7 : vector<128x128xf32> to vector<128x128xbf16>
    %c0_10 = arith.constant 0 : index
    %c0_11 = arith.constant 0 : index
    %9 = vector.load %arg6[%c0_10, %c0_11] : memref<128x128xbf16, #tpu.memory_space<vmem>>, vector<128x128xbf16>
    %cst_12 = arith.constant dense<0.000000e+00> : vector<128x128xf32>
    %10 = tpu.matmul %8, %9, %cst_12 {dimension_numbers = #tpu.dot_dimension_numbers<[1], [0], [0], [1], [0, 0, 1, 1], [], []>} : vector<128x128xbf16>, vector<128x128xbf16>, vector<128x128xf32> -> vector<128x128xf32>
    %11 = vector.shape_cast %10 : vector<128x128xf32> to vector<8x16x128xf32>
    %12 = vector.shape_cast %6 : vector<8x128xf32> to vector<8x1x128xf32>
    %13 = vector.broadcast %12 : vector<8x1x128xf32> to vector<8x16x128xf32>
    %14 = arith.addf %13, %11 : vector<8x16x128xf32>
    %c0_13 = arith.constant 0 : index
    %c0_14 = arith.constant 0 : index
    %15 = vector.load %arg7[%c0_13, %c0_14] : memref<1x128xf32, #tpu.memory_space<vmem>>, vector<1x128xf32>
    %16 = vector.shape_cast %15 : vector<1x128xf32> to vector<1x1x128xf32>
    %17 = vector.broadcast %16 : vector<1x1x128xf32> to vector<8x16x128xf32>
    %18 = arith.addf %14, %17 : vector<8x16x128xf32>
    %19 = math.tanh %18 : vector<8x16x128xf32>
    %c0_15 = arith.constant 0 : index
    %c0_16 = arith.constant 0 : index
    %20 = vector.load %arg8[%c0_15, %c0_16] : memref<1x128xf32, #tpu.memory_space<vmem>>, vector<1x128xf32>
    %21 = vector.shape_cast %20 : vector<1x128xf32> to vector<1x1x128xf32>
    %22 = vector.broadcast %21 : vector<1x1x128xf32> to vector<8x16x128xf32>
    %23 = arith.mulf %19, %22 : vector<8x16x128xf32>
    %cst_17 = arith.constant dense<0.000000e+00> : vector<8x16xf32>
    %24 = vector.multi_reduction <add>, %23, %cst_17 [2] : vector<8x16x128xf32> to vector<8x16xf32>
    %25 = arith.addf %24, %3 : vector<8x16xf32>
    %cst_18 = arith.constant dense<0xFF800000> : vector<8xf32>
    %26 = vector.multi_reduction <maximumf>, %25, %cst_18 [1] : vector<8x16xf32> to vector<8xf32>
    %27 = vector.shape_cast %26 : vector<8xf32> to vector<8x1xf32>
    %28 = vector.broadcast %27 : vector<8x1xf32> to vector<8x16xf32>
    %29 = arith.subf %25, %28 : vector<8x16xf32>
    %30 = math.exp %29 : vector<8x16xf32>
    %cst_19 = arith.constant dense<0.000000e+00> : vector<8xf32>
    %31 = vector.multi_reduction <add>, %30, %cst_19 [1] : vector<8x16xf32> to vector<8xf32>
    %32 = vector.shape_cast %31 : vector<8xf32> to vector<8x1xf32>
    %33 = vector.broadcast %32 : vector<8x1xf32> to vector<8x16xf32>
    %34 = arith.divf %30, %33 : vector<8x16xf32>
    %35 = vector.shape_cast %34 : vector<8x16xf32> to vector<8x1x16xf32>
    "tpu.trace_start"() <{level = 10 : i32, message = "bqs,bsh->bqh"}> : () -> ()
    %cst_20 = arith.constant dense<0.000000e+00> : vector<8x1x128xf32>
    %36 = tpu.matmul %35, %2, %cst_20 {dimension_numbers = #tpu.dot_dimension_numbers<[2], [1], [1], [2], [0, 0, 0, 1, 1, 2], [0], [0]>} : vector<8x1x16xf32>, vector<8x16x128xf32>, vector<8x1x128xf32> -> vector<8x1x128xf32>
    "tpu.trace_stop"() : () -> ()
    %37 = vector.shape_cast %36 : vector<8x1x128xf32> to vector<8x128xf32>
    %38 = arith.truncf %0 : vector<8x64xf32> to vector<8x64xbf16>
    %c0_21 = arith.constant 0 : index
    %c0_22 = arith.constant 0 : index
    %39 = vector.load %arg9[%c0_21, %c0_22] : memref<64x384xbf16, #tpu.memory_space<vmem>>, vector<64x384xbf16>
    %cst_23 = arith.constant dense<0.000000e+00> : vector<8x384xf32>
    %40 = tpu.matmul %38, %39, %cst_23 {dimension_numbers = #tpu.dot_dimension_numbers<[1], [0], [0], [1], [0, 0, 1, 1], [], []>} : vector<8x64xbf16>, vector<64x384xbf16>, vector<8x384xf32> -> vector<8x384xf32>
    %41 = arith.truncf %37 : vector<8x128xf32> to vector<8x128xbf16>
    %c0_24 = arith.constant 0 : index
    %c0_25 = arith.constant 0 : index
    %42 = vector.load %arg10[%c0_24, %c0_25] : memref<128x384xbf16, #tpu.memory_space<vmem>>, vector<128x384xbf16>
    %cst_26 = arith.constant dense<0.000000e+00> : vector<8x384xf32>
    %43 = tpu.matmul %41, %42, %cst_26 {dimension_numbers = #tpu.dot_dimension_numbers<[1], [0], [0], [1], [0, 0, 1, 1], [], []>} : vector<8x128xbf16>, vector<128x384xbf16>, vector<8x384xf32> -> vector<8x384xf32>
    %44 = arith.addf %40, %43 : vector<8x384xf32>
    %c0_27 = arith.constant 0 : index
    %c0_28 = arith.constant 0 : index
    %45 = vector.load %arg12[%c0_27, %c0_28] : memref<1x384xf32, #tpu.memory_space<vmem>>, vector<1x384xf32>
    %46 = vector.broadcast %45 : vector<1x384xf32> to vector<8x384xf32>
    %47 = arith.addf %44, %46 : vector<8x384xf32>
    %c0_29 = arith.constant 0 : index
    %c0_30 = arith.constant 0 : index
    %48 = vector.load %arg11[%c0_29, %c0_30] : memref<128x384xbf16, #tpu.memory_space<vmem>>, vector<128x384xbf16>
    %cst_31 = arith.constant dense<0.000000e+00> : vector<8x384xf32>
    %49 = tpu.matmul %4, %48, %cst_31 {dimension_numbers = #tpu.dot_dimension_numbers<[1], [0], [0], [1], [0, 0, 1, 1], [], []>} : vector<8x128xbf16>, vector<128x384xbf16>, vector<8x384xf32> -> vector<8x384xf32>
    %c0_32 = arith.constant 0 : index
    %c0_33 = arith.constant 0 : index
    %50 = vector.load %arg13[%c0_32, %c0_33] : memref<1x384xf32, #tpu.memory_space<vmem>>, vector<1x384xf32>
    %51 = vector.broadcast %50 : vector<1x384xf32> to vector<8x384xf32>
    %52 = arith.addf %49, %51 : vector<8x384xf32>
    %53 = vector.extract_strided_slice %47 {offsets = [0, 0], sizes = [8, 128], strides = [1, 1]} : vector<8x384xf32> to vector<8x128xf32>
    %54 = vector.extract_strided_slice %52 {offsets = [0, 0], sizes = [8, 128], strides = [1, 1]} : vector<8x384xf32> to vector<8x128xf32>
    %55 = arith.addf %53, %54 : vector<8x128xf32>
    %56 = arith.negf %55 : vector<8x128xf32>
    %57 = math.exp %56 : vector<8x128xf32>
    %cst_34 = arith.constant 1.000000e+00 : f32
    %58 = vector.broadcast %cst_34 : f32 to vector<8x128xf32>
    %59 = arith.addf %58, %57 : vector<8x128xf32>
    %60 = arith.divf %58, %59 : vector<8x128xf32>
    %61 = vector.extract_strided_slice %47 {offsets = [0, 128], sizes = [8, 128], strides = [1, 1]} : vector<8x384xf32> to vector<8x128xf32>
    %62 = vector.extract_strided_slice %52 {offsets = [0, 128], sizes = [8, 128], strides = [1, 1]} : vector<8x384xf32> to vector<8x128xf32>
    %63 = arith.addf %61, %62 : vector<8x128xf32>
    %64 = arith.negf %63 : vector<8x128xf32>
    %65 = math.exp %64 : vector<8x128xf32>
    %cst_35 = arith.constant 1.000000e+00 : f32
    %66 = vector.broadcast %cst_35 : f32 to vector<8x128xf32>
    %67 = arith.addf %66, %65 : vector<8x128xf32>
    %68 = arith.divf %66, %67 : vector<8x128xf32>
    %69 = vector.extract_strided_slice %47 {offsets = [0, 256], sizes = [8, 128], strides = [1, 1]} : vector<8x384xf32> to vector<8x128xf32>
    %70 = vector.extract_strided_slice %52 {offsets = [0, 256], sizes = [8, 128], strides = [1, 1]} : vector<8x384xf32> to vector<8x128xf32>
    %71 = arith.mulf %60, %70 : vector<8x128xf32>
    %72 = arith.addf %69, %71 : vector<8x128xf32>
    %73 = math.tanh %72 : vector<8x128xf32>
    %cst_36 = arith.constant 1.000000e+00 : f32
    %74 = vector.broadcast %cst_36 : f32 to vector<8x128xf32>
    %75 = arith.subf %74, %68 : vector<8x128xf32>
    %76 = arith.mulf %75, %73 : vector<8x128xf32>
    %77 = arith.mulf %68, %1 : vector<8x128xf32>
    %78 = arith.addf %76, %77 : vector<8x128xf32>
    %c0_37 = arith.constant 0 : index
    %c0_38 = arith.constant 0 : index
    %79 = vector.load %arg14[%c0_37, %c0_38] : memref<8x128xf32, #tpu.memory_space<vmem>>, vector<8x128xf32>
    tpu.vector_store %arg14[%c0_37, %c0_38], %37 {strides = array<i32>} : memref<8x128xf32, #tpu.memory_space<vmem>>, vector<8x128xf32>,
    %c0_39 = arith.constant 0 : index
    %c0_40 = arith.constant 0 : index
    %80 = vector.load %arg15[%c0_39, %c0_40] : memref<8x128xf32, #tpu.memory_space<vmem>>, vector<8x128xf32>
    tpu.vector_store %arg15[%c0_39, %c0_40], %78 {strides = array<i32>} : memref<8x128xf32, #tpu.memory_space<vmem>>, vector<8x128xf32>,
    return
  }
  func.func @transform_0(%arg0: i32) -> (i32, i32) {
    %c0_i32 = arith.constant 0 : i32
    %c0_i32_0 = arith.constant 0 : i32
    %c0_i32_1 = arith.constant 0 : i32
    return %c0_i32, %c0_i32_0 : i32, i32
  }
  func.func @transform_1(%arg0: i32) -> (i32, i32) {
    %c0_i32 = arith.constant 0 : i32
    %c0_i32_0 = arith.constant 0 : i32
    %c0_i32_1 = arith.constant 0 : i32
    return %c0_i32, %c0_i32_0 : i32, i32
  }
  func.func @transform_2(%arg0: i32) -> (i32, i32, i32) {
    %c0_i32 = arith.constant 0 : i32
    %c0_i32_0 = arith.constant 0 : i32
    %c0_i32_1 = arith.constant 0 : i32
    %c0_i32_2 = arith.constant 0 : i32
    return %c0_i32, %c0_i32_0, %c0_i32_1 : i32, i32, i32
  }
  func.func @transform_3(%arg0: i32) -> (i32, i32) {
    %c0_i32 = arith.constant 0 : i32
    %c0_i32_0 = arith.constant 0 : i32
    %c0_i32_1 = arith.constant 0 : i32
    return %c0_i32, %c0_i32_0 : i32, i32
  }
  func.func @transform_4(%arg0: i32) -> (i32, i32) {
    %c0_i32 = arith.constant 0 : i32
    %c0_i32_0 = arith.constant 0 : i32
    %c0_i32_1 = arith.constant 0 : i32
    return %c0_i32, %c0_i32_0 : i32, i32
  }
  func.func @transform_5(%arg0: i32) -> (i32, i32) {
    %c0_i32 = arith.constant 0 : i32
    %c0_i32_0 = arith.constant 0 : i32
    %c0_i32_1 = arith.constant 0 : i32
    return %c0_i32, %c0_i32_0 : i32, i32
  }
  func.func @transform_6(%arg0: i32) -> (i32, i32) {
    %c0_i32 = arith.constant 0 : i32
    %c0_i32_0 = arith.constant 0 : i32
    %c0_i32_1 = arith.constant 0 : i32
    return %c0_i32, %c0_i32_0 : i32, i32
  }
  func.func @transform_7(%arg0: i32) -> (i32, i32) {
    %c0_i32 = arith.constant 0 : i32
    %c0_i32_0 = arith.constant 0 : i32
    %c0_i32_1 = arith.constant 0 : i32
    return %c0_i32, %c0_i32_0 : i32, i32
  }
  func.func @transform_8(%arg0: i32) -> (i32, i32) {
    %c0_i32 = arith.constant 0 : i32
    %c0_i32_0 = arith.constant 0 : i32
    %c0_i32_1 = arith.constant 0 : i32
    return %c0_i32, %c0_i32_0 : i32, i32
  }
  func.func @transform_9(%arg0: i32) -> (i32, i32) {
    %c0_i32 = arith.constant 0 : i32
    %c0_i32_0 = arith.constant 0 : i32
    %c0_i32_1 = arith.constant 0 : i32
    return %c0_i32, %c0_i32_0 : i32, i32
  }
  func.func @transform_10(%arg0: i32) -> (i32, i32) {
    %c0_i32 = arith.constant 0 : i32
    %c0_i32_0 = arith.constant 0 : i32
    %c0_i32_1 = arith.constant 0 : i32
    return %c0_i32, %c0_i32_0 : i32, i32
  }
  func.func @transform_11(%arg0: i32) -> (i32, i32) {
    %c0_i32 = arith.constant 0 : i32
    %c0_i32_0 = arith.constant 0 : i32
    %c0_i32_1 = arith.constant 0 : i32
    return %c0_i32, %c0_i32_0 : i32, i32
  }
  func.func @transform_12(%arg0: i32) -> (i32, i32) {
    %c0_i32 = arith.constant 0 : i32
    %c0_i32_0 = arith.constant 0 : i32
    %c0_i32_1 = arith.constant 0 : i32
    return %c0_i32, %c0_i32_0 : i32, i32
  }
  func.func @transform_13(%arg0: i32) -> (i32, i32) {
    %c0_i32 = arith.constant 0 : i32
    %c0_i32_0 = arith.constant 0 : i32
    %c0_i32_1 = arith.constant 0 : i32
    return %c0_i32, %c0_i32_0 : i32, i32
  }
  func.func @transform_14(%arg0: i32) -> (i32, i32) {
    %c0_i32 = arith.constant 0 : i32
    %c0_i32_0 = arith.constant 0 : i32
    %c0_i32_1 = arith.constant 0 : i32
    return %c0_i32, %c0_i32_0 : i32, i32
  }
}

</mosaic_0001>

<bundles_post_ra>
// kernel: decoder_forward.3
= control target key start
LH: loop header
LB: loop body
LE: loop exit
PB: predicated region body
PF: predicated region fallthrough
CT: control target
= control target key end

     0   :  { %s1353_s0 = inlined_call_operand.vmem [shape: f32[8,64], index: 0, kind: input, shape index: {}]   ;;  %s1354_s1 = inlined_call_operand.vmem [shape: f32[8,128], index: 1, kind: input, shape index: {}]   ;;  %s1355_s2 = inlined_call_operand.vmem [shape: f32[8,128], index: 2, kind: input, shape index: {}]   ;;  %s1356_s3 = inlined_call_operand.hbm [shape: bf16[64,256], index: 3, kind: input, shape index: {}]   ;;  %s1357_s4 = inlined_call_operand.hbm [shape: bf16[128,256], index: 4, kind: input, shape index: {}]   ;;  %s1358_s5 = inlined_call_operand.hbm [shape: bf16[128,256], index: 5, kind: input, shape index: {}]   ;;  %s1359_s6 = inlined_call_operand.vmem [shape: f32[1,256], index: 6, kind: input, shape index: {}]   ;;  %s1360_s7 = inlined_call_operand.hbm [shape: f32[8,256], index: 7, kind: output, shape index: {}]  }
   0x1   :  { %1373 = sst [smem:[#allocation18_spill]] %s1357_s4 }
   0x2   :  { %12 = vsyncpa [#allocation3], 0 }
   0x3   :  { %14 = vsyncpa [#allocation3 + $0x1], 0 }
   0x4   :  { %15 = vsyncpa [#allocation6], 0 }
   0x5   :  { %17 = vsyncpa [#allocation6 + $0x1], 0 }
   0x6   :  { %18 = vsyncpa [#allocation4], 0 }
   0x7   :  { %20 = vsyncpa [#allocation4 + $0x1], 0  ;;  %s1130_s24 = smov 0   ;;  %s1132_s25 = smov 0  }
   0x8   :  { %s1134_s26 = smov 0   ;;  %s1136_s27 = smov 0  }
   0x9 LB: > { %1374 = sst [smem:[#allocation12_spill]] %s1073_s24  ;;  %s1151_s28 = sadd.s32 4294967295, %s1085_s27   ;;  %s1085_s27 = sphi %s1136_s27, %s1392_s27   ;;  %s1081_s26 = sphi %s1134_s26, %s1394_s26   ;;  %s1077_s25 = sphi %s1132_s25, %s1396_s25   ;;  %s1073_s24 = sphi %s1130_s24, %s1395_s24  }
   0xa   : > { %1375 = sst [smem:[#allocation13_spill]] %s1081_s26  ;;  %s746_s29 = sadd.s32 4294967294, %s1085_s27  }
   0xb   : > { %s1155_s30 = sadd.s32 1, %s1085_s27   ;;  %s96_s8 = sadd.s32 1, %s1081_s26 }
   0xc   : > { %1376 = sst [smem:[#allocation14_spill]] %s1155_s30  ;;  %s93_s9 = ssub.s32 %s1085_s27, %s1155_s30 }
   0xd   : > { %p103_p0 = scmp.ne.s32.totalorder %s1081_s26, %s1077_s25  ;;  %p94_p1 = scmp.eq.s32.totalorder %s93_s9, 0 }
   0xe   : > { %p104_p2 = scmp.eq.s32.totalorder %s1085_s27, 0  ;;  %p109_p3 = scmp.ne.s32.totalorder %s1077_s25, %s1073_s24 }
   0xf   : > { %p110_p4 = scmp.eq.s32.totalorder %s1151_s28, 0  ;;  %p211_p7 = scmp.eq.s32.totalorder %s1151_s28, 1 }
  0x10   : > { %s1167_s10 = scalar_select %p94_p1, %s1081_s26, %s96_s8  }
  0x11   : > { %p105_p5 = por %p104_p2, %p103_p0  ;;  %p1169_p6 = por %p110_p4, %p109_p3 }
  0x12   : > { %1377 = sst [smem:[#allocation15_spill]] %s1167_s10  ;;  %p217_p8 = scmp.eq.s32.totalorder %s746_s29, 1 }
  0x13   : > { %p748_p9 = scmp.ge.s32.totalorder %s1085_s27, 2  ;;  %p887_p10 = scmp.lt.s32.totalorder %s1085_s27, 2 }
  0x14   : > { %p1176_p11 = por %p211_p7, %p103_p0  ;;  %p1180_p12 = por %p217_p8, %p109_p3 }
  0x15   : > { %s1185_s14 = sand.u32 1, %s1081_s26   ;;  %s1188_s15 = sshll.u32 %s1085_s27, 2 }
  0x16   : > { %s1379_s12 = scalar_select %p1176_p11, 1, 0 }
  0x17   : > { %s1381_s13 = scalar_select %p1180_p12, 1, 0 }
  0x18   : > { %1380 = sst [smem:[#allocation16_spill]] %s1379_s12  ;;  %p1190_p13 = pnand %p887_p10, %p105_p5 }
  0x19   : > { %1382 = sst [smem:[#allocation17_spill]] %s1381_s13  ;;  %s267_s17 = sand.u32 1, %s1085_s27  }
  0x1a   : > { %s1361_s18 = sshll.u32 %s1185_s14, 6  ;;  %s1384_s4 = sld [smem:[#allocation18_spill]] }
  0x1b   : > { %s271_s23 = scalar_lea.vmem [#allocation5], %s1361_s18  ;;  %s1202_s8 = scalar_lea.sflag [#allocation6], %s267_s17 }
  0x1c   : > { %s278_s29 = sshll.u32 %s271_s23, 4  ;;  %p929_p1 = pneg %p1190_p13  ;;  %s279_s29 = int_to_ptr.vmem [resolvable:$true] %s278_s29 }
  0x20   : > { %s275_s21 = scalar_lea.hbm %s1384_s4, %s1188_s15 }
  0x21   : > { %s276_s22 = sshll.u32 %s275_s21, 4  ;;  %s932_s21 = scalar_lea.hbm %s1384_s4, 128  ;;  %s277_s22 = int_to_ptr.hbm [resolvable:$true] %s276_s22 }
  0x22   : > { %s925_s9 = sshra.s32 %s277_s22, 4  ;;  %s926_s9 = int_to_ptr.hbm [resolvable:$true] %s925_s9 }
  0x23   : > { %s927_s10 = scalar_lea.hbm %s926_s9, 64  ;;  %p933_p4 = scmp.lt.s32.totalorder %s926_s9, %s1384_s4 }
  0x24   : > { %p928_p0 = scmp.ne.s32.totalorder %s926_s9, %s927_s10  ;;  %p934_p5 = scmp.lt.s32.totalorder %s932_s21, %s927_s10 }
  0x26   : > { %p930_p2 = pnand %p929_p1, %p928_p0  ;;  %p935_p7 = por %p934_p5, %p933_p4 }
  0x28   : > { %p931_p3 = pneg %p930_p2 }
  0x2a   : > { %p936_p8 = pnand %p935_p7, %p931_p3 }
  0x2c   : > { %939 = shalt.err (!%p936_p8)
}
  0x2d   : > { %s1369_s17 = smov 128   ;;  %s1371_s26 = smov 64  }
  0x2e   : > { %s1089_s19 = smov 4   ;;  %p755_p10 = scmp.ge.s32.totalorder %s1085_s27, 1 }
  0x2f   : > { %879 = dma.hbm_to_vmem [thread:$0]  (!%p1190_p13), %s277_s22, 1024, %s279_s29, %s1202_s8, %s1369_s17, %s1371_s26, %s1089_s19  }
  0x30   : > { %p313_p0 = scmp.lt.s32.totalorder %s1085_s27, 3  ;;  %s1385_s10 = sshll.u32 %s1185_s14, 6 }
  0x31   : > { %s292_s18 = scalar_lea.vmem [#allocation7], %s1385_s10  ;;  %s749_s21 = sshll.u32 %s1185_s14, 5 }
  0x32   : > { %s299_s9 = sshll.u32 %s292_s18, 4  ;;  %p1225_p2 = pnand %p755_p10, %p313_p0  ;;  %s300_s9 = int_to_ptr.vmem [resolvable:$true] %s299_s9 }
  0x33   : > { %s254_s30 = scalar_lea.hbm %s1356_s3, %s1188_s15  ;;  %s250_s24 = scalar_lea.vmem [#allocation2], %s749_s21 }
  0x34   : > { %s255_s13 = sshll.u32 %s254_s30, 4  ;;  %s257_s12 = sshll.u32 %s250_s24, 4  ;;  %s256_s13 = int_to_ptr.hbm [resolvable:$true] %s255_s13  ;;  %s258_s12 = int_to_ptr.vmem [resolvable:$true] %s257_s12 }
  0x35   : > { %s247_s22 = scalar_lea.sflag [#allocation3], %s1185_s14  ;;  %s955_s29 = sshra.s32 %s256_s13, 4  ;;  %s956_s29 = int_to_ptr.hbm [resolvable:$true] %s955_s29 }
  0x36   : > { %s957_s17 = scalar_lea.hbm %s956_s29, 32  ;;  %s962_s26 = scalar_lea.hbm %s1356_s3, 64 }
  0x37   : > { %p958_p3 = scmp.ne.s32.totalorder %s956_s29, %s957_s17  ;;  %p963_p7 = scmp.lt.s32.totalorder %s956_s29, %s1356_s3 }
  0x38   : > { %p964_p8 = scmp.lt.s32.totalorder %s962_s26, %s957_s17 }
  0x39   : > { %p960_p4 = pnand %p958_p3, %p929_p1 }
  0x3a   : > { %p965_p10 = por %p964_p8, %p963_p7 }
  0x3b   : > { %p961_p5 = pneg %p960_p4 }
  0x3d   : > { %p966_p0 = pnand %p965_p10, %p961_p5 }
  0x3f   : > { %969 = shalt.err (!%p966_p0)
}
  0x40   : > { %s1387_s24 = smov 64   ;;  %s1388_s30 = smov 128  }
  0x41   : > { %876 = dma.hbm_to_vmem [thread:$0]  (!%p1190_p13), %s256_s13, 512, %s258_s12, %s247_s22, %s1388_s30, %s1387_s24, %s1089_s19  }
  0x42   : > { %s296_s10 = scalar_lea.hbm %s1358_s5, %s1188_s15  ;;  %s992_s23 = scalar_lea.hbm %s1358_s5, 128 }
  0x43   : > { %s297_s18 = sshll.u32 %s296_s10, 4  ;;  %s298_s18 = int_to_ptr.hbm [resolvable:$true] %s297_s18 }
  0x44   : > { %s985_s29 = sshra.s32 %s298_s18, 4  ;;  %s986_s29 = int_to_ptr.hbm [resolvable:$true] %s985_s29 }
  0x45   : > { %s987_s26 = scalar_lea.hbm %s986_s29, 64  ;;  %p993_p7 = scmp.lt.s32.totalorder %s986_s29, %s1358_s5 }
  0x46   : > { %p988_p3 = scmp.ne.s32.totalorder %s986_s29, %s987_s26  ;;  %p994_p8 = scmp.lt.s32.totalorder %s992_s23, %s987_s26 }
  0x48   : > { %p990_p4 = pnand %p988_p3, %p929_p1  ;;  %p995_p10 = por %p994_p8, %p993_p7 }
  0x4a   : > { %p991_p5 = pneg %p990_p4 }
  0x4c   : > { %p996_p0 = pnand %p995_p10, %p991_p5 }
  0x4e   : > { %999 = shalt.err (!%p996_p0)
}
  0x4f   : > { %882 = dma.hbm_to_vmem [thread:$0]  (!%p1190_p13), %s298_s18, 1024, %s300_s9, %s1202_s8, %s1388_s30, %s1387_s24, %s1089_s19  }
  0x50   : > { %317 = sbr.rel (%p1225_p2) target bundleno = 262 (0x106), region = 48  ;;  %s1271_s15 = sand.u32 (!%p1225_p2), 1, %s1077_s25  }
  0x51   : > { %s756_s22 = sshll.u32 (!%p1225_p2), %s1271_s15, 5  ;;  %s320_s14 = scalar_lea.sflag (!%p1225_p2), [#allocation3], %s1271_s15 }
  0x52   : > { %s323_s21 = scalar_lea.vmem (!%p1225_p2), [#allocation2], %s756_s22 }
  0x55   : > { %1060 = dma.done.wait (%p1169_p6), %s320_s14, 512  }
  0x56   : > { %1062 = vsyncadd (%p1169_p6), %s320_s14, 4294966784  ;;  %s329_s16 = sand.u32 1, %s1151_s28   ;;  %s757_s8 = sshll.u32 %s1271_s15, 6 }
  0x57   : > { %s330_s19 = scalar_lea.sflag [#allocation6], %s329_s16  ;;  %s1281_s9 = scalar_lea.vmem [#allocation5], %s757_s8 }
  0x58   : > { %1064 = dma.done.wait (%p1169_p6), %s330_s19, 2048  }
  0x59   : > { %1066 = vsyncadd (%p1169_p6), %s330_s19, 4294965248  ;;  %v856_v0 = vld [vmem:[%s1281_s9 + $0x38] sm:$0xff]  ;;  %s1288_s20 = scalar_lea.vmem [#allocation7], %s757_s8  ;;  %v855_v2 = vld [vmem:[%s1281_s9 + $0x30] sm:$0xff]  ;;  %vm507_vm0 = vcmask 523264   ;;  %p388_p6 = scmp.lt.s32.totalorder %s1151_s28, 1 }
  0x5a   : > { %v864_v1 = vld [vmem:[%s1288_s20 + $0x38] sm:$0xff]  ;;  %470 = vmatpush.bf16.msra.mxu0 %v856_v0  ;;  %v863_v3 = vld [vmem:[%s1288_s20 + $0x30] sm:$0xff]  ;;  %v854_v6 = vld [vmem:[%s1281_s9 + $0x28] sm:$0xff]  ;;  %s759_s12 = sshll.u32 %s1271_s15, 3  ;;  %s842_s13 = sshll.u32 %s1151_s28, 3 }
  0x5b   : > { %588 = vmatpush.bf16.msra.mxu2 %v864_v1  ;;  %v848_v4 = vld [vmem:[%s323_s21 + $0x18] sm:$0xff]  ;;  %v847_v5 = vld [vmem:[%s323_s21 + $0x10] sm:$0xff]  ;;  %v862_v7 = vld [vmem:[%s1288_s20 + $0x28] sm:$0xff]  ;;  %s389_s26 = scalar_select %p388_p6, %s1151_s28, 1 }
  0x5c   : > { %515 = vmatpush.bf16.msra.mxu1 %v848_v4  ;;  %v846_v8 = vld [vmem:[%s323_s21 + $0x8] sm:$0xff]  ;;  %v853_v9 = vld [vmem:[%s1281_s9 + $0x20] sm:$0xff]  ;;  %v852_v13 = vld [vmem:[%s1281_s9 + $0x18] sm:$0xff]  ;;  %s387_s8 = scalar_lea.vmem [#allocation8], %s759_s12  ;;  %s1035_s10 = scalar_lea.hbm %s1360_s7, 16 }
  0x5d   : > { %v861_v10 = vld [vmem:[%s1288_s20 + $0x20] sm:$0xff]  ;;  %v860_v14 = vld [vmem:[%s1288_s20 + $0x18] sm:$0xff]  ;;  %v851_v16 = vld [vmem:[%s1281_s9 + $0x10] sm:$0xff]  ;;  %s390_s23 = scalar_lea.vmem %s1359_s6, %s389_s26  ;;  %s621_s19 = sshll.u32 %s387_s8, 4  ;;  %s622_s19 = int_to_ptr.vmem [resolvable:$true] %s621_s19 }
  0x5e   : > { %471 = vmatpush.bf16.msra.mxu0 %v855_v2  ;;  %v845_v11 = vld [vmem:[%s323_s21] sm:$0xff]  ;;  %v859_v17 = vld [vmem:[%s1288_s20 + $0x10] sm:$0xff]  ;;  %v850_v18 = vld [vmem:[%s1281_s9 + $0x8] sm:$0xff]  ;;  %s619_s21 = scalar_lea.hbm %s1360_s7, %s842_s13 }
  0x5f   : > { %589 = vmatpush.bf16.msra.mxu2 %v863_v3  ;;  %v392_v12 = vld [vmem:[%s1353_s0] sm:$0xff]  ;;  %v858_v19 = vld [vmem:[%s1288_s20 + $0x8] sm:$0xff] }
  0x60   : > { %516 = vmatpush.bf16.msra.mxu1 %v847_v5  ;;  %v393_v15 = vpack.c.bf16 %v392_v12, %v392_v12  ;;  %v849_v20 = vld [vmem:[%s1281_s9] sm:$0xff]  ;;  %s623_s9 = sshll.u32 %s619_s21, 4  ;;  %s624_s9 = int_to_ptr.hbm [resolvable:$true] %s623_s9 }
  0x61   : > { %v857_v21 = vld [vmem:[%s1288_s20] sm:$0xff]  ;;  %s609_s20 = scalar_lea.sflag [#allocation4], %s1271_s15  ;;  %s1029_s11 = sshra.s32 %s624_s9, 4  ;;  %s1030_s11 = int_to_ptr.hbm [resolvable:$true] %s1029_s11 }
  0x62   : > { %472 = vmatpush.bf16.msra.mxu0 %v854_v6  ;;  %v394_v22 = vld [vmem:[%s1354_s1] sm:$0xff]  ;;  %s1031_s28 = scalar_lea.hbm %s1030_s11, 8  ;;  %p1036_p3 = scmp.lt.s32.totalorder %s1030_s11, %s1360_s7 }
  0x63   : > { %590 = vmatpush.bf16.msra.mxu2 %v862_v7  ;;  %v396_v23 = vld [vmem:[%s1355_s2] sm:$0xff]  ;;  %v395_v24 = vpack.c.bf16 %v394_v22, %v394_v22  ;;  %p1032_p13 = scmp.ne.s32.totalorder %s1030_s11, %s1031_s28  ;;  %p1037_p4 = scmp.lt.s32.totalorder %s1035_s10, %s1031_s28 }
  0x64   : > { %517 = vmatpush.bf16.msra.mxu1 %v846_v8  ;;  %v397_v25 = vpack.c.bf16 %v396_v23, %v396_v23  ;;  %v924_v30 = vld [vmem:[%s390_s23] ss:$0 sm:$0xff] }
  0x65   : > { %p1033_p1 = pnand %p1032_p13, %p1176_p11  ;;  %p1038_p5 = por %p1037_p4, %p1036_p3 }
  0x66   : > { %473 = vmatpush.bf16.msra.mxu0 %v853_v9 }
  0x67   : > { %591 = vmatpush.bf16.msra.mxu2 %v861_v10  ;;  %p1034_p2 = pneg %p1033_p1 }
  0x68   : > { %518 = vmatpush.bf16.msra.mxu1 %v845_v11 }
  0x69   : > { %p1039_p7 = pnand %p1038_p5, %p1034_p2 }
  0x6a   : > { %474 = vmatpush.bf16.msra.mxu0 %v852_v13 }
  0x6b   : > { %592 = vmatpush.bf16.msra.mxu2 %v860_v14  ;;  %808 = vmatmul.msk.bf16.vlgmr.msra.gmra.mxu1 %vm507_vm0, %v393_v15 }
  0x6e   : > { %475 = vmatpush.bf16.msra.mxu0 %v851_v16 }
  0x6f   : > { %593 = vmatpush.bf16.msra.mxu2 %v859_v17 }
  0x72   : > { %476 = vmatpush.bf16.msra.mxu0 %v850_v18 }
  0x73   : > { %594 = vmatpush.bf16.msra.mxu2 %v858_v19 }
  0x76   : > { %477 = vmatpush.bf16.msra.mxu0 %v849_v20 }
  0x77   : > { %595 = vmatpush.bf16.msra.mxu2 %v857_v21 }
  0x79   : > { %478 = vmatmul.bf16.vlgmr.msra.gmra.mxu0 %v395_v24 }
  0x7a   : > { %596 = vmatmul.bf16.vlgmr.msra.gmra.mxu2 %v397_v25 }
  0xe8   : > { %v520_v26 = vpop.f32.mrf.mxu1 }
  0xf0   : > { %v522_v27 = vpop.f32.mrf.mxu1 }
  0xf6   : > { %v479_v28 = vpop.f32.mrf.mxu0 }
  0xf7   : > { %v521_v29 = vadd.f32 %v520_v26, %v479_v28 }
  0xfd   : > { %v597_v31 = vpop.f32.mrf.mxu2 }
  0xfe   : > { %v601_v32 = vadd.f32 %v597_v31, %v521_v29  ;;  %v481_v33 = vpop.f32.mrf.mxu0 }
 0x100   : > { %v606_v34 = vadd.f32 %v924_v30, %v601_v32 }
 0x102   : > { %607 = vst [vmem:[%s387_s8] sm:$0xff] %v606_v34 }
 0x103   : > { %1042 = shalt.err (!%p1039_p7)
}
 0x104   : > { %871 = dma.vmem_to_hbm [thread:$0]  (%p1176_p11), %s622_s19, 128, %s624_s9, %s609_s20  }
 0x105   : > { %v599_v35 = vpop.f32.mrf.mxu2 }
 0x106 PF: > { %s1390_s15 = sld [smem:[#allocation12_spill]]  ;;  %p884_p8 = pnand %p748_p9, %p1180_p12 }
 0x108   : > { %p885_p10 = pneg %p884_p8 }
 0x10c   : > { %s635_s17 = sand.u32 1, %s1390_s15  }
 0x10d   : > { %s636_s4 = scalar_lea.sflag [#allocation4], %s635_s17 }
 0x10e   : > { %1068 = dma.done.wait (%p885_p10), %s636_s4, 128  }
 0x10f   : > { %1070 = vsyncadd (%p885_p10), %s636_s4, 4294967168  ;;  %s1392_s27 = sld [smem:[#allocation14_spill]]  ;;  %s1395_s24 = smov %s1077_s25 }
 0x110   : > { %s1393_s23 = sld [smem:[#allocation13_spill]] }
 0x111   : > { %s1394_s26 = sld [smem:[#allocation15_spill]] }
 0x115   : > { %p23_p0 = scmp.ge.s32.totalorder %s1392_s27, 4  }
 0x116   : > { %s1396_s25 = smov %s1393_s23 }
 0x117   :  { %25 = sbr.rel (!%p23_p0) target bundleno = 9 (0x9), region = 120 }
 0x11c   :  { %642 = vsyncpa [#allocation3], 1 }
 0x11d   :  { %644 = vsyncpa [#allocation3 + $0x1], 1 }
 0x11e   :  { %645 = vsyncpa [#allocation6], 1 }
 0x11f   :  { %647 = vsyncpa [#allocation6 + $0x1], 1 }
 0x120   :  { %648 = vsyncpa [#allocation4], 1 }
 0x121   :  { %650 = vsyncpa [#allocation4 + $0x1], 1 }

// kernel: decoder_forward.2
= control target key start
LH: loop header
LB: loop body
LE: loop exit
PB: predicated region body
PF: predicated region fallthrough
CT: control target
= control target key end

     0   :  { %20 = vsyncpa [#allocation3], 0  ;;  %s3356_s0 = inlined_call_operand.vmem [shape: f32[8,64], index: 0, kind: input, shape index: {}]   ;;  %s3357_s1 = inlined_call_operand.vmem [shape: f32[8,128], index: 1, kind: input, shape index: {}]   ;;  %s3358_s2 = inlined_call_operand.hbm [shape: f32[8,16,128], index: 2, kind: input, shape index: {}]   ;;  %s3359_s3 = inlined_call_operand.vmem [shape: f32[8,16], index: 3, kind: input, shape index: {}]   ;;  %s3360_s4 = inlined_call_operand.vmem [shape: bf16[128,128], index: 4, kind: input, shape index: {}]   ;;  %s3361_s5 = inlined_call_operand.hbm [shape: bf16[128,128], index: 5, kind: input, shape index: {}]   ;;  %s3362_s6 = inlined_call_operand.vmem [shape: f32[1,128], index: 6, kind: input, shape index: {}]   ;;  %s3363_s7 = inlined_call_operand.vmem [shape: f32[1,128], index: 7, kind: input, shape index: {}]   ;;  %s3364_s8 = inlined_call_operand.hbm [shape: bf16[64,384], index: 8, kind: input, shape index: {}]   ;;  %s3365_s9 = inlined_call_operand.vmem [shape: bf16[128,384], index: 9, kind: input, shape index: {}]   ;;  %s3366_s10 = inlined_call_operand.vmem [shape: bf16[128,384], index: 10, kind: input, shape index: {}]   ;;  %s3367_s11 = inlined_call_operand.vmem [shape: f32[1,384], index: 11, kind: input, shape index: {}]   ;;  %s3368_s12 = inlined_call_operand.vmem [shape: f32[1,384], index: 12, kind: input, shape index: {}]   ;;  %s3369_s13 = inlined_call_operand.vmem [shape: f32[8,128], index: 13, kind: output, shape index: {0}]   ;;  %s3370_s14 = inlined_call_operand.vmem [shape: f32[8,128], index: 14, kind: output, shape index: {1}]  }
   0x1   :  { %21 = vsyncpa [#allocation5], 0  ;;  %s47_s15 = sshll.u32 %s3361_s5, 4  ;;  %s2517_s16 = smov [#allocation4]   ;;  %s48_s15 = int_to_ptr.hbm [resolvable:$true] %s47_s15 }
   0x2   :  { %s49_s17 = sshll.u32 %s2517_s16, 4  ;;  %s30_s20 = sshll.u32 %s3358_s2, 4  ;;  %s50_s17 = int_to_ptr.vmem [resolvable:$true] %s49_s17  ;;  %s31_s20 = int_to_ptr.hbm [resolvable:$true] %s30_s20 }
   0x3   :  { %s2518_s21 = smov 64   ;;  %s2519_s22 = smov 4  }
   0x4   :  { %55 = dma.hbm_to_vmem [thread:$0]  %s48_s15, 1024, %s50_s17, [#allocation5], %s2518_s21, %s2518_s21, %s2519_s22  }
   0x5   :  { %s2520_s23 = smov [#allocation2]   ;;  %s2521_s25 = smov 128  }
   0x6   :  { %s32_s24 = sshll.u32 %s2520_s23, 4  ;;  %s2522_s26 = smov 8   ;;  %s33_s24 = int_to_ptr.vmem [resolvable:$true] %s32_s24 }
   0x7   :  { %38 = dma.hbm_to_vmem [thread:$0]  %s31_s20, 2048, %s33_s24, [#allocation3], %s2521_s25, %s2521_s25, %s2522_s26  }
   0x8   :  { %s64_s28 = sshll.u32 %s3364_s8, 4  ;;  %s2523_s29 = smov [#allocation6]   ;;  %s65_s28 = int_to_ptr.hbm [resolvable:$true] %s64_s28 }
   0x9   :  { %s66_s30 = sshll.u32 %s2523_s29, 4  ;;  %s2524_s16 = smov 192   ;;  %s67_s30 = int_to_ptr.vmem [resolvable:$true] %s66_s30 }
   0xa   :  { %s2525_s2 = smov 12  }
   0xb   :  { %72 = dma.hbm_to_vmem [thread:$0]  %s65_s28, 1536, %s67_s30, [#allocation5], %s2524_s16, %s2524_s16, %s2525_s2  }
   0xc   :  { %2513 = dma.done.wait [#allocation3], 2048  }
   0xd   :  { %2514 = vsyncadd [#allocation3], 4294965248 }
   0xe   :  { %2515 = dma.done.wait [#allocation5], 2560  }
   0xf   :  { %2516 = vsyncadd [#allocation5], 4294964736  ;;  %v2248_v0 = vld [vmem:[%s3360_s4 + $0x38] sm:$0xff]  ;;  %v2247_v2 = vld [vmem:[%s3360_s4 + $0x30] sm:$0xff]  ;;  %v442_v25 = vlaneseq  ;;  %vm646_vm0 = vcmask 130112   ;;  %vm669_vm1 = vcmask 1041409  }
  0x10   :  { %v2256_v1 = vld [vmem:[#allocation4 + $0x38] sm:$0xff]  ;;  %178 = vmatpush.bf16.msra.mxu0 %v2248_v0  ;;  %v2255_v3 = vld [vmem:[#allocation4 + $0x30] sm:$0xff]  ;;  %v2246_v4 = vld [vmem:[%s3360_s4 + $0x28] sm:$0xff]  ;;  %vm671_vm2 = vcmask 1042434   ;;  %vm673_vm3 = vcmask 1043459   ;;  %vm675_vm4 = vcmask 1044484  }
  0x11   :  { %263 = vmatpush.bf16.msra.mxu1 %v2256_v1  ;;  %v2254_v5 = vld [vmem:[#allocation4 + $0x28] sm:$0xff]  ;;  %v99_v7 = vld [vmem:[#allocation2 + $0x18] sm:$0xff]  ;;  %v96_v8 = vld [vmem:[#allocation2] sm:$0xff]  ;;  %v443_v27 = vshrl.u32 %v442_v25, 7  ;;  %vm677_vm5 = vcmask 1045509   ;;  %vm679_vm6 = vcmask 1046534  }
  0x12   :  { %v97_v6 = vld [vmem:[#allocation2 + $0x8] sm:$0xff]  ;;  %1057 = vmatpush.msra.mxu3 %v99_v7  ;;  %v98_v9 = vld [vmem:[#allocation2 + $0x10] sm:$0xff]  ;;  %v2245_v10 = vld [vmem:[%s3360_s4 + $0x20] sm:$0xff]  ;;  %vm681_vm7 = vcmask 1047559   ;;  %vm684_vm8 = vcmask 130048  }
  0x13   :  { %1024 = vmatpush.msra.mxu2 %v97_v6  ;;  %v2253_v11 = vld [vmem:[#allocation4 + $0x20] sm:$0xff]  ;;  %v2244_v12 = vld [vmem:[%s3360_s4 + $0x18] sm:$0xff]  ;;  %v2243_v14 = vld [vmem:[%s3360_s4 + $0x10] sm:$0xff]  ;;  %v191_v24 = vpack.c.bf16 %v97_v6, %v96_v8  ;;  %2327 = vset.pattern.permute.xlu0 %v443_v27  ;;  %v192_v29 = vpack.c.bf16 %v99_v7, %v98_v9  ;;  %v450_v35 = vadd.s32 8, %v443_v27 }
  0x14   :  { %179 = vmatpush.bf16.msra.mxu0 %v2247_v2  ;;  %1058 = vmatpush.msra.mxu3 %v98_v9  ;;  %v2252_v13 = vld [vmem:[#allocation4 + $0x18] sm:$0xff]  ;;  %v2251_v15 = vld [vmem:[#allocation4 + $0x10] sm:$0xff]  ;;  %v101_v16 = vld [vmem:[#allocation2 + $0x28] sm:$0xff] }
  0x15   :  { %264 = vmatpush.bf16.msra.mxu1 %v2255_v3  ;;  %1025 = vmatpush.msra.mxu2 %v96_v8  ;;  %v100_v17 = vld [vmem:[#allocation2 + $0x20] sm:$0xff]  ;;  %v2242_v18 = vld [vmem:[%s3360_s4 + $0x8] sm:$0xff]  ;;  %v103_v26 = vld [vmem:[#allocation2 + $0x38] sm:$0xff] }
  0x16   :  { %v2250_v19 = vld [vmem:[#allocation4 + $0x8] sm:$0xff]  ;;  %v2241_v20 = vld [vmem:[%s3360_s4] sm:$0xff]  ;;  %1123 = vmatpush.msrb.mxu3 %v103_v26  ;;  %v102_v28 = vld [vmem:[#allocation2 + $0x30] sm:$0xff]  ;;  %2329 = vset.pattern.permute.xlu2 %v443_v27  ;;  %v193_v34 = vpack.c.bf16 %v101_v16, %v100_v17 }
  0x17   :  { %1090 = vmatpush.msrb.mxu2 %v101_v16  ;;  %v2249_v21 = vld [vmem:[#allocation4] sm:$0xff]  ;;  %2328 = vset.pattern.permute.xlu1 %v450_v35  ;;  %v194_v38 = vpack.c.bf16 %v103_v26, %v102_v28  ;;  %v105_v41 = vld [vmem:[#allocation2 + $0x48] sm:$0xff]  ;;  %v106_v44 = vld [vmem:[#allocation2 + $0x50] sm:$0xff] }
  0x18   :  { %180 = vmatpush.bf16.msra.mxu0 %v2246_v4  ;;  %v95_v22 = vld [vmem:[%s3357_s1] sm:$0xff]  ;;  %1124 = vmatpush.msrb.mxu3 %v102_v28  ;;  %v107_v45 = vld [vmem:[#allocation2 + $0x58] sm:$0xff]  ;;  %v109_v49 = vld [vmem:[#allocation2 + $0x68] sm:$0xff] }
  0x19   :  { %265 = vmatpush.bf16.msra.mxu1 %v2254_v5  ;;  %1091 = vmatpush.msrb.mxu2 %v100_v17  ;;  %v2638_v23 = vpack.c.bf16 %v95_v22, %v95_v22  ;;  %v112_v30 = vld [vmem:[%s3359_s3] sm:$0xff]  ;;  %v196_v46 = vpack.c.bf16 %v107_v45, %v106_v44  ;;  %v110_v51 = vld [vmem:[#allocation2 + $0x70] sm:$0xff]  ;;  %v111_v52 = vld [vmem:[#allocation2 + $0x78] sm:$0xff] }
  0x1a   :  { %v441_v31 = vperm.slane %v112_v30, 0  ;;  %v454_v32 = vperm.slane %v112_v30, 1  ;;  %v467_v33 = vperm.slane %v112_v30, 2  ;;  %v493_v36 = vperm.slane %v112_v30, 4  ;;  %v104_v40 = vld [vmem:[#allocation2 + $0x40] sm:$0xff] }
  0x1b   :  { %v519_v37 = vperm.slane %v112_v30, 6  ;;  %v480_v39 = vperm.slane %v112_v30, 3  ;;  %v195_v42 = vpack.c.bf16 %v105_v41, %v104_v40  ;;  %v506_v43 = vperm.slane %v112_v30, 5  ;;  %v108_v48 = vld [vmem:[#allocation2 + $0x60] sm:$0xff] }
  0x1c   :  { %181 = vmatpush.bf16.msra.mxu0 %v2245_v10  ;;  %446 = vperm.xlu0 %2327, %v441_v31   ;;  %v532_v47 = vperm.slane %v112_v30, 7  ;;  %v197_v50 = vpack.c.bf16 %v109_v49, %v108_v48  ;;  %v198_v53 = vpack.c.bf16 %v111_v52, %v110_v51  ;;  %v2651_v57 = vld [vmem:[%s3362_s6] ss:$0 sm:$0xff] }
  0x1d   :  { %266 = vmatpush.bf16.msra.mxu1 %v2253_v11  ;;  %v2658_v0 = vld [vmem:[%s3363_s7] ss:$0 sm:$0xff] }
  0x1e   :  { %459 = vperm.xlu2 %2329, %v454_v32  }
  0x1f   :  { %452 = vperm.xlu1 %2328, %v441_v31  }
  0x20   :  { %182 = vmatpush.bf16.msra.mxu0 %v2244_v12 }
  0x21   :  { %267 = vmatpush.bf16.msra.mxu1 %v2252_v13 }
  0x24   :  { %183 = vmatpush.bf16.msra.mxu0 %v2243_v14  ;;  %472 = vperm.xlu0 %2327, %v467_v33  }
  0x25   :  { %268 = vmatpush.bf16.msra.mxu1 %v2251_v15 }
  0x26   :  { %2330 = vset.pattern.permute.xlu2 %v450_v35 }
  0x27   :  { %491 = vperm.xlu1 %2328, %v480_v39  }
  0x28   :  { %184 = vmatpush.bf16.msra.mxu0 %v2242_v18 }
  0x29   :  { %269 = vmatpush.bf16.msra.mxu1 %v2250_v19 }
  0x2c   :  { %185 = vmatpush.bf16.msra.mxu0 %v2241_v20  ;;  %498 = vperm.xlu0 %2327, %v493_v36  }
  0x2d   :  { %270 = vmatpush.bf16.msra.mxu1 %v2249_v21 }
  0x2e   :  { %465 = vperm.xlu2 %2330, %v454_v32  }
  0x2f   :  { %186 = vmatmul.bf16.vlgmr.msra.gmra.mxu0 %v2638_v23  ;;  %2333 = vset.pattern.permute.xlu1 %v443_v27 }
  0x30   :  { %271 = vmatmul.bf16.vlgmr.msra.gmra.mxu1 %v191_v24 }
  0x34   :  { %524 = vperm.xlu0 %2327, %v519_v37  }
  0x36   :  { %2331 = vset.pattern.permute.xlu2 %v443_v27 }
  0x37   :  { %511 = vperm.xlu1 %2333, %v506_v43  }
  0x3c   :  { %2334 = vset.pattern.permute.xlu0 %v450_v35 }
  0x3e   :  { %485 = vperm.xlu2 %2331, %v480_v39  }
  0x3f   :  { %2336 = vset.pattern.permute.xlu1 %v450_v35 }
  0x40   :  { %276 = vmatmul.bf16.gmra.mxu1 %v192_v29 }
  0x44   :  { %478 = vperm.xlu0 %2334, %v467_v33  }
  0x46   :  { %2332 = vset.pattern.permute.xlu2 %v450_v35 }
  0x47   :  { %543 = vperm.xlu1 %2336, %v532_v47  }
  0x4c   :  { %530 = vperm.xlu0 %2334, %v519_v37  }
  0x4e   :  { %504 = vperm.xlu2 %2332, %v493_v36  }
  0x50   :  { %281 = vmatmul.bf16.gmra.mxu1 %v193_v34 }
  0x56   :  { %517 = vperm.xlu2 %2332, %v506_v43  }
  0x5e   :  { %2335 = vset.pattern.permute.xlu2 %v443_v27 }
  0x60   :  { %286 = vmatmul.bf16.gmra.mxu1 %v194_v38 }
  0x66   :  { %537 = vperm.xlu2 %2335, %v532_v47  }
  0x70   :  { %291 = vmatmul.bf16.gmra.mxu1 %v195_v42 }
  0x80   :  { %296 = vmatmul.bf16.gmra.mxu1 %v196_v46 }
  0x90   :  { %301 = vmatmul.bf16.gmra.mxu1 %v197_v50  ;;  %v2679_v50 = vpop.permute.xlu0 %446 }
  0xa0   :  { %306 = vmatmul.bf16.gmra.mxu1 %v198_v53 }
  0xac   :  { %v2645_v54 = vpop.f32.mrf.mxu0 }
  0xad   :  { %v272_v55 = vpop.f32.mrf.mxu1  ;;  %v320_v56 = vperm.slane %v2645_v54, 0  ;;  %v313_v63 = vrot.slane %v2645_v54, 1  ;;  %v314_v12 = vrot.slane %v2645_v54, 2  ;;  %v315_v26 = vrot.slane %v2645_v54, 3 }
  0xae   :  { %v316_v38 = vrot.slane %v2645_v54, 4  ;;  %v317_v53 = vrot.slane %v2645_v54, 5 }
  0xaf   :  { %v336_v58 = vadd.f32 %v320_v56, %v272_v55  ;;  %v321_v3 = vperm.slane %v313_v63, 0  ;;  %v322_v16 = vperm.slane %v314_v12, 0  ;;  %v323_v30 = vperm.slane %v315_v26, 0 }
  0xb0   :  { %v324_v42 = vperm.slane %v316_v38, 0 }
  0xb1   :  { %v356_v59 = vadd.f32 %v2651_v57, %v336_v58 }
  0xb3   :  { %2342 = vtanh.f32 %v356_v59 }
  0xb4   :  { %v189_v61 = vpop.f32.mrf.mxu0 }
  0xb5   :  { %v274_v60 = vpop.f32.mrf.mxu1 }
  0xb6   :  { %v337_v62 = vadd.f32 %v320_v56, %v274_v60  ;;  %v325_v56 = vperm.slane %v317_v53, 0 }
  0xb8   :  { %v357_v1 = vadd.f32 %v2651_v57, %v337_v62  ;;  %v2685_v62 = vpop.permute.xlu0 %472 }
  0xb9   :  { %v2343_v2 = vpop.eup %2342 }
  0xba   :  { %2344 = vtanh.f32 %v357_v1  ;;  %v392_v4 = vmul.f32 %v2343_v2, %v2658_v0 }
  0xbc   :  { %408 = vadd.xlane.f32.xlu0 %v392_v4 }
  0xbd   :  { %v277_v5 = vpop.f32.mrf.mxu1 }
  0xbe   :  { %v338_v6 = vadd.f32 %v321_v3, %v277_v5  ;;  %v318_v5 = vrot.slane %v2645_v54, 6 }
  0xc0   :  { %v2345_v7 = vpop.eup %2344  ;;  %v358_v8 = vadd.f32 %v2651_v57, %v338_v6 }
  0xc1   :  { %v393_v9 = vmul.f32 %v2345_v7, %v2658_v0  ;;  %v2691_v7 = vpop.permute.xlu0 %498 }
  0xc2   :  { %2346 = vtanh.f32 %v358_v8  ;;  %v326_v8 = vperm.slane %v318_v5, 0 }
  0xc4   :  { %410 = vadd.xlane.f32.xlu0 %v393_v9 }
  0xc5   :  { %v279_v10 = vpop.f32.mrf.mxu1 }
  0xc6   :  { %v339_v11 = vadd.f32 %v321_v3, %v279_v10 }
  0xc8   :  { %v2347_v13 = vpop.eup %2346  ;;  %v359_v14 = vadd.f32 %v2651_v57, %v339_v11 }
  0xc9   :  { %v394_v15 = vmul.f32 %v2347_v13, %v2658_v0 }
  0xca   :  { %2348 = vtanh.f32 %v359_v14  ;;  %v2695_v14 = vpop.permute.xlu0 %524 }
  0xcb   :  { %412 = vadd.xlane.f32.xlu1 %v394_v15  ;;  %v2526_v15 = vmov 0  }
  0xcc   :  { %2337 = vset.pattern.permute.xlu0 %v2526_v15  ;;  %2338 = vset.pattern.permute.xlu2 %v2526_v15 }
  0xcd   :  { %v282_v17 = vpop.f32.mrf.mxu1  ;;  %2339 = vset.pattern.permute.xlu1 %v2526_v15 }
  0xce   :  { %v340_v18 = vadd.f32 %v322_v16, %v282_v17 }
  0xd0   :  { %v2349_v19 = vpop.eup %2348  ;;  %v360_v20 = vadd.f32 %v2651_v57, %v340_v18 }
  0xd1   :  { %v395_v21 = vmul.f32 %v2349_v19, %v2658_v0 }
  0xd2   :  { %2350 = vtanh.f32 %v360_v20  ;;  %v453_v20 = vpop.permute.xlu1 %452 }
  0xd3   :  { %414 = vadd.xlane.f32.xlu1 %v395_v21  ;;  %v319_v21 = vrot.slane %v2645_v54, 7 }
  0xd5   :  { %v284_v22 = vpop.f32.mrf.mxu1  ;;  %v327_v26 = vperm.slane %v319_v21, 0 }
  0xd6   :  { %v341_v24 = vadd.f32 %v322_v16, %v284_v22  ;;  %v460_v22 = vpop.permute.xlu2 %459 }
  0xd8   :  { %v2351_v27 = vpop.eup %2350  ;;  %v361_v28 = vadd.f32 %v2651_v57, %v341_v24 }
  0xd9   :  { %v396_v29 = vmul.f32 %v2351_v27, %v2658_v0 }
  0xda   :  { %2352 = vtanh.f32 %v361_v28 }
  0xdb   :  { %416 = vadd.xlane.f32.xlu2 %v396_v29  ;;  %v479_v29 = vpop.permute.xlu0 %478 }
  0xdd   :  { %v287_v31 = vpop.f32.mrf.mxu1 }
  0xde   :  { %v342_v32 = vadd.f32 %v323_v30, %v287_v31 }
  0xe0   :  { %v2353_v33 = vpop.eup %2352  ;;  %v362_v34 = vadd.f32 %v2651_v57, %v342_v32  ;;  %v466_v32 = vpop.permute.xlu2 %465 }
  0xe1   :  { %v397_v35 = vmul.f32 %v2353_v33, %v2658_v0 }
  0xe2   :  { %2354 = vtanh.f32 %v362_v34  ;;  %v492_v34 = vpop.permute.xlu1 %491 }
  0xe3   :  { %418 = vadd.xlane.f32.xlu2 %v397_v35  ;;  %v531_v38 = vpop.permute.xlu0 %530 }
  0xe5   :  { %v289_v36 = vpop.f32.mrf.mxu1 }
  0xe6   :  { %v343_v37 = vadd.f32 %v323_v30, %v289_v36 }
  0xe8   :  { %v2355_v39 = vpop.eup %2354  ;;  %v363_v40 = vadd.f32 %v2651_v57, %v343_v37 }
  0xe9   :  { %v398_v41 = vmul.f32 %v2355_v39, %v2658_v0  ;;  %v486_v39 = vpop.permute.xlu2 %485 }
  0xea   :  { %2356 = vtanh.f32 %v363_v40 }
  0xeb   :  { %420 = vadd.xlane.f32.xlu1 %v398_v41  ;;  %v512_v41 = vpop.permute.xlu1 %511 }
  0xed   :  { %v292_v43 = vpop.f32.mrf.mxu1 }
  0xee   :  { %v344_v44 = vadd.f32 %v324_v42, %v292_v43 }
  0xf0   :  { %v2357_v45 = vpop.eup %2356  ;;  %v364_v46 = vadd.f32 %v2651_v57, %v344_v44 }
  0xf1   :  { %v399_v47 = vmul.f32 %v2357_v45, %v2658_v0  ;;  %v505_v45 = vpop.permute.xlu2 %504 }
  0xf2   :  { %2358 = vtanh.f32 %v364_v46 }
  0xf3   :  { %422 = vadd.xlane.f32.xlu2 %v399_v47  ;;  %v544_v46 = vpop.permute.xlu1 %543 }
  0xf5   :  { %v294_v48 = vpop.f32.mrf.mxu1 }
  0xf6   :  { %v345_v49 = vadd.f32 %v324_v42, %v294_v48 }
  0xf8   :  { %v2359_v51 = vpop.eup %2358  ;;  %v365_v52 = vadd.f32 %v2651_v57, %v345_v49 }
  0xf9   :  { %v400_v55 = vmul.f32 %v2359_v51, %v2658_v0 }
  0xfa   :  { %2360 = vtanh.f32 %v365_v52 }
  0xfb   :  { %424 = vadd.xlane.f32.xlu0 %v400_v55 }
  0xfd   :  { %v297_v58 = vpop.f32.mrf.mxu1 }
  0xfe   :  { %v346_v59 = vadd.f32 %v325_v56, %v297_v58 }
 0x100   :  { %v2361_v60 = vpop.eup %2360  ;;  %v366_v61 = vadd.f32 %v2651_v57, %v346_v59 }
 0x101   :  { %v401_v63 = vmul.f32 %v2361_v60, %v2658_v0 }
 0x102   :  { %2362 = vtanh.f32 %v366_v61 }
 0x103   :  { %426 = vadd.xlane.f32.xlu1 %v401_v63 }
 0x105   :  { %v299_v1 = vpop.f32.mrf.mxu1 }
 0x106   :  { %v347_v2 = vadd.f32 %v325_v56, %v299_v1 }
 0x108   :  { %v2363_v3 = vpop.eup %2362  ;;  %v367_v4 = vadd.f32 %v2651_v57, %v347_v2 }
 0x109   :  { %v402_v6 = vmul.f32 %v2363_v3, %v2658_v0 }
 0x10a   :  { %2364 = vtanh.f32 %v367_v4 }
 0x10b   :  { %428 = vadd.xlane.f32.xlu2 %v402_v6 }
 0x10d   :  { %v302_v9 = vpop.f32.mrf.mxu1 }
 0x10e   :  { %v348_v10 = vadd.f32 %v326_v8, %v302_v9 }
 0x110   :  { %v2365_v11 = vpop.eup %2364  ;;  %v368_v12 = vadd.f32 %v2651_v57, %v348_v10 }
 0x111   :  { %v403_v13 = vmul.f32 %v2365_v11, %v2658_v0 }
 0x112   :  { %2366 = vtanh.f32 %v368_v12 }
 0x113   :  { %430 = vadd.xlane.f32.xlu1 %v403_v13 }
 0x115   :  { %v304_v16 = vpop.f32.mrf.mxu1 }
 0x116   :  { %v349_v17 = vadd.f32 %v326_v8, %v304_v16 }
 0x118   :  { %v2367_v18 = vpop.eup %2366  ;;  %v369_v19 = vadd.f32 %v2651_v57, %v349_v17 }
 0x119   :  { %v404_v24 = vmul.f32 %v2367_v18, %v2658_v0 }
 0x11a   :  { %2368 = vtanh.f32 %v369_v19 }
 0x11b   :  { %432 = vadd.xlane.f32.xlu1 %v404_v24 }
 0x11d   :  { %v307_v27 = vpop.f32.mrf.mxu1 }
 0x11e   :  { %v350_v28 = vadd.f32 %v327_v26, %v307_v27 }
 0x120   :  { %v2369_v30 = vpop.eup %2368  ;;  %v370_v31 = vadd.f32 %v2651_v57, %v350_v28 }
 0x121   :  { %v405_v33 = vmul.f32 %v2369_v30, %v2658_v0 }
 0x122   :  { %2370 = vtanh.f32 %v370_v31 }
 0x123   :  { %434 = vadd.xlane.f32.xlu0 %v405_v33 }
 0x125   :  { %v309_v35 = vpop.f32.mrf.mxu1 }
 0x126   :  { %v351_v54 = vadd.f32 %v327_v26, %v309_v35 }
 0x128   :  { %v2371_v36 = vpop.eup %2370  ;;  %v371_v37 = vadd.f32 %v2651_v57, %v351_v54  ;;  %v518_v57 = vpop.permute.xlu2 %517 }
 0x129   :  { %v406_v40 = vmul.f32 %v2371_v36, %v2658_v0 }
 0x12a   :  { %2372 = vtanh.f32 %v371_v37 }
 0x12b   :  { %436 = vadd.xlane.f32.xlu2 %v406_v40 }
 0x12f   :  { %v409_v44 = vpop.xlane.xlu0 %408 }
 0x130   :  { %v2373_v42 = vpop.eup %2372  ;;  %v2706_v47 = vadd.f32 %v2679_v50, %v409_v44 }
 0x131   :  { %v407_v43 = vmul.f32 %v2373_v42, %v2658_v0  ;;  %v538_v0 = vpop.permute.xlu2 %537 }
 0x133   :  { %438 = vadd.xlane.f32.xlu1 %v407_v43 }
 0x137   :  { %594 = vperm.xlu0 %2337, %v2706_v47   ;;  %v411_v48 = vpop.xlane.xlu0 %410 }
 0x138   :  { %v2711_v52 = vadd.f32 %v453_v20, %v411_v48 }
 0x13e   :  { %v413_v49 = vpop.xlane.xlu1 %412 }
 0x13f   :  { %v2709_v51 = vadd.f32 %v460_v22, %v413_v49 }
 0x141   :  { %600 = vperm.xlu0 %2337, %v2709_v51  }
 0x143   :  { %597 = vperm.xlu2 %2338, %v2711_v52  }
 0x146   :  { %v415_v53 = vpop.xlane.xlu1 %414 }
 0x147   :  { %v2715_v55 = vadd.f32 %v466_v32, %v415_v53 }
 0x14c   :  { %603 = vperm.xlu1 %2339, %v2715_v55  }
 0x14e   :  { %v417_v50 = vpop.xlane.xlu2 %416 }
 0x14f   :  { %v2719_v56 = vadd.f32 %v2685_v62, %v417_v50 }
 0x151   :  { %606 = vperm.xlu2 %2338, %v2719_v56  }
 0x156   :  { %v419_v58 = vpop.xlane.xlu2 %418 }
 0x157   :  { %v2722_v59 = vadd.f32 %v479_v29, %v419_v58  ;;  %v2758_v29 = vand.u32 127, %v442_v25 }
 0x159   :  { %609 = vperm.xlu0 %2337, %v2722_v59   ;;  %v2761_v31 = vadd.s32 4294967288, %v2758_v29 }
 0x15e   :  { %v421_v60 = vpop.xlane.xlu1 %420 }
 0x15f   :  { %v2725_v61 = vadd.f32 %v486_v39, %v421_v60 }
 0x161   :  { %612 = vperm.xlu1 %2339, %v2725_v61  }
 0x166   :  { %v423_v63 = vpop.xlane.xlu2 %422 }
 0x167   :  { %v2728_v1 = vadd.f32 %v492_v34, %v423_v63 }
 0x169   :  { %615 = vperm.xlu2 %2338, %v2728_v1  }
 0x16e   :  { %v425_v2 = vpop.xlane.xlu0 %424 }
 0x16f   :  { %v2732_v62 = vadd.f32 %v2691_v7, %v425_v2 }
 0x171   :  { %618 = vperm.xlu0 %2337, %v2732_v62  }
 0x176   :  { %v427_v3 = vpop.xlane.xlu1 %426 }
 0x177   :  { %v2735_v4 = vadd.f32 %v505_v45, %v427_v3 }
 0x179   :  { %621 = vperm.xlu1 %2339, %v2735_v4  }
 0x17e   :  { %v429_v5 = vpop.xlane.xlu2 %428 }
 0x17f   :  { %v2738_v6 = vadd.f32 %v512_v41, %v429_v5 }
 0x181   :  { %624 = vperm.xlu2 %2338, %v2738_v6  }
 0x186   :  { %v431_v8 = vpop.xlane.xlu1 %430 }
 0x187   :  { %v2741_v9 = vadd.f32 %v518_v57, %v431_v8 }
 0x189   :  { %627 = vperm.xlu0 %2337, %v2741_v9  }
 0x18e   :  { %v433_v10 = vpop.xlane.xlu1 %432 }
 0x18f   :  { %v2745_v7 = vadd.f32 %v2695_v14, %v433_v10 }
 0x191   :  { %630 = vperm.xlu1 %2339, %v2745_v7  }
 0x196   :  { %v435_v11 = vpop.xlane.xlu0 %434 }
 0x197   :  { %v2748_v12 = vadd.f32 %v531_v38, %v435_v11 }
 0x199   :  { %633 = vperm.xlu2 %2338, %v2748_v12  }
 0x19e   :  { %v437_v13 = vpop.xlane.xlu2 %436 }
 0x19f   :  { %v2751_v15 = vadd.f32 %v538_v0, %v437_v13 }
 0x1a1   :  { %636 = vperm.xlu0 %2337, %v2751_v15  }
 0x1a6   :  { %v439_v16 = vpop.xlane.xlu1 %438  ;;  %v598_v14 = vpop.permute.xlu2 %597 }
 0x1a7   :  { %v2754_v17 = vadd.f32 %v544_v46, %v439_v16  ;;  %v645_v39 = vperm.slane %v598_v14, %v2761_v31 }
 0x1a9   :  { %639 = vperm.xlu1 %2339, %v2754_v17   ;;  %v595_v18 = vpop.permute.xlu0 %594 }
 0x1aa   :  { %v643_v54 = vperm.slane %v595_v18, %v2758_v29 }
 0x1ac   :  { %v647_v57 = vsel %vm646_vm0, %v645_v39, %v643_v54 }
 0x1ae   :  { %v607_v21 = vpop.permute.xlu2 %606 }
 0x1af   :  { %v651_v25 = vperm.slane %v607_v21, %v2758_v29 }
 0x1b3   :  { %v601_v19 = vpop.permute.xlu0 %600 }
 0x1b4   :  { %v648_v36 = vperm.slane %v601_v19, %v2758_v29 }
 0x1be   :  { %v604_v20 = vpop.permute.xlu1 %603 }
 0x1bf   :  { %v649_v33 = vperm.slane %v604_v20, %v2761_v31 }
 0x1c1   :  { %v650_v40 = vsel %vm646_vm0, %v649_v33, %v648_v36 }
 0x1c2   :  { %v670_v0 = vsel %vm669_vm1, %v650_v40, %v647_v57 }
 0x1c3   :  { %v616_v26 = vpop.permute.xlu2 %615 }
 0x1c4   :  { %v655_v41 = vperm.slane %v616_v26, %v2761_v31 }
 0x1cb   :  { %v610_v22 = vpop.permute.xlu0 %609 }
 0x1cc   :  { %v652_v34 = vperm.slane %v610_v22, %v2761_v31 }
 0x1ce   :  { %v653_v44 = vsel %vm646_vm0, %v652_v34, %v651_v25 }
 0x1cf   :  { %v672_v60 = vsel %vm671_vm2, %v653_v44, %v670_v0 }
 0x1d3   :  { %v613_v24 = vpop.permute.xlu1 %612 }
 0x1d4   :  { %v654_v37 = vperm.slane %v613_v24, %v2758_v29 }
 0x1d6   :  { %v656_v48 = vsel %vm646_vm0, %v655_v41, %v654_v37 }
 0x1d7   :  { %v674_v2 = vsel %vm673_vm3, %v656_v48, %v672_v60 }
 0x1db   :  { %v625_v30 = vpop.permute.xlu2 %624 }
 0x1dc   :  { %v660_v49 = vperm.slane %v625_v30, %v2758_v29 }
 0x1e3   :  { %v619_v27 = vpop.permute.xlu0 %618 }
 0x1e4   :  { %v657_v45 = vperm.slane %v619_v27, %v2758_v29 }
 0x1eb   :  { %v622_v28 = vpop.permute.xlu1 %621 }
 0x1ec   :  { %v658_v38 = vperm.slane %v622_v28, %v2761_v31 }
 0x1ee   :  { %v659_v53 = vsel %vm646_vm0, %v658_v38, %v657_v45 }
 0x1ef   :  { %v676_v8 = vsel %vm675_vm4, %v659_v53, %v674_v2 }
 0x1f3   :  { %v634_v42 = vpop.permute.xlu2 %633 }
 0x1f4   :  { %v664_v50 = vperm.slane %v634_v42, %v2761_v31 }
 0x1fb   :  { %v628_v32 = vpop.permute.xlu0 %627 }
 0x1fc   :  { %v661_v43 = vperm.slane %v628_v32, %v2761_v31 }
 0x1fe   :  { %v662_v63 = vsel %vm646_vm0, %v661_v43, %v660_v49 }
 0x1ff   :  { %v678_v13 = vsel %vm677_vm5, %v662_v63, %v676_v8 }
 0x203   :  { %v631_v35 = vpop.permute.xlu1 %630 }
 0x204   :  { %v663_v46 = vperm.slane %v631_v35, %v2758_v29 }
 0x206   :  { %v665_v3 = vsel %vm646_vm0, %v664_v50, %v663_v46 }
 0x207   :  { %v680_v18 = vsel %vm679_vm6, %v665_v3, %v678_v13 }
 0x213   :  { %v637_v58 = vpop.permute.xlu0 %636 }
 0x214   :  { %v666_v10 = vperm.slane %v637_v58, %v2758_v29 }
 0x21b   :  { %v640_v5 = vpop.permute.xlu1 %639 }
 0x21c   :  { %v667_v11 = vperm.slane %v640_v5, %v2761_v31 }
 0x21e   :  { %v668_v16 = vsel %vm646_vm0, %v667_v11, %v666_v10 }
 0x21f   :  { %v682_v14 = vsel %vm681_vm7, %v668_v16, %v680_v18 }
 0x220   :  { %v685_v19 = vsel %vm684_vm8, %v682_v14, -inf }
 0x221   :  { %686 = vmax.xlane.f32.xlu2 %v685_v19 }
 0x294   :  { %v2795_v20 = vpop.xlane.xlu2 %686 }
 0x295   :  { %v694_v21 = vperm.slane %v2795_v20, 5  ;;  %v689_v22 = vperm.slane %v2795_v20, 0  ;;  %v690_v28 = vperm.slane %v2795_v20, 1  ;;  %v691_v36 = vperm.slane %v2795_v20, 2 }
 0x296   :  { %v692_v38 = vperm.slane %v2795_v20, 3 }
 0x297   :  { %v715_v24 = vsub.f32 %v2738_v6, %v694_v21  ;;  %v706_v26 = vsub.f32 %v2711_v52, %v689_v22  ;;  %v705_v27 = vsub.f32 %v2706_v47, %v689_v22  ;;  %v708_v34 = vsub.f32 %v2715_v55, %v690_v28 }
 0x298   :  { %v707_v35 = vsub.f32 %v2709_v51, %v690_v28  ;;  %v710_v55 = vsub.f32 %v2722_v59, %v691_v36  ;;  %v709_v51 = vsub.f32 %v2719_v56, %v691_v36  ;;  %v712_v42 = vsub.f32 %v2728_v1, %v692_v38 }
 0x299   :  { %v741_v30 = vmul.f32 1.442695, %v715_v24  ;;  %v723_v32 = vmul.f32 1.442695, %v706_v26  ;;  %v721_v33 = vmul.f32 1.442695, %v705_v27  ;;  %v711_v59 = vsub.f32 %v2725_v61, %v692_v38 }
 0x29a   :  { %v727_v54 = vmul.f32 1.442695, %v708_v34  ;;  %v725_v52 = vmul.f32 1.442695, %v707_v35  ;;  %v731_v25 = vmul.f32 1.442695, %v710_v55 }
 0x29b   :  { %2374 = vpow2.f32 %v741_v30  ;;  %v729_v39 = vmul.f32 1.442695, %v709_v51  ;;  %v735_v43 = vmul.f32 1.442695, %v712_v42  ;;  %v693_v56 = vperm.slane %v2795_v20, 4 }
 0x29c   :  { %2376 = vpow2.f32 %v723_v32  ;;  %v733_v44 = vmul.f32 1.442695, %v711_v59  ;;  %v695_v61 = vperm.slane %v2795_v20, 6 }
 0x29d   :  { %2378 = vpow2.f32 %v721_v33  ;;  %v714_v57 = vsub.f32 %v2735_v4, %v693_v56  ;;  %v713_v1 = vsub.f32 %v2732_v62, %v693_v56  ;;  %v716_v4 = vsub.f32 %v2741_v9, %v694_v21 }
 0x29e   :  { %2380 = vpow2.f32 %v727_v54  ;;  %v717_v50 = vsub.f32 %v2745_v7, %v695_v61  ;;  %v696_v62 = vperm.slane %v2795_v20, 7  ;;  %v718_v7 = vsub.f32 %v2748_v12, %v695_v61 }
 0x29f   :  { %2382 = vpow2.f32 %v725_v52  ;;  %v739_v48 = vmul.f32 1.442695, %v714_v57  ;;  %v737_v49 = vmul.f32 1.442695, %v713_v1  ;;  %v743_v60 = vmul.f32 1.442695, %v716_v4 }
 0x2a0   :  { %2384 = vpow2.f32 %v731_v25  ;;  %v745_v58 = vmul.f32 1.442695, %v717_v50  ;;  %v719_v3 = vsub.f32 %v2751_v15, %v696_v62  ;;  %v747_v9 = vmul.f32 1.442695, %v718_v7 }
 0x2a1   :  { %v2806_v6 = vpop.eup %2374  ;;  %2386 = vpow2.f32 %v729_v39  ;;  %v720_v11 = vsub.f32 %v2754_v17, %v696_v62 }
 0x2a2   :  { %v2808_v37 = vpop.eup %2376  ;;  %800 = vperm.xlu2 %2338, %v2806_v6   ;;  %2388 = vpow2.f32 %v735_v43  ;;  %v749_v5 = vmul.f32 1.442695, %v719_v3 }
 0x2a3   :  { %v2811_v47 = vpop.eup %2378  ;;  %773 = vperm.xlu1 %2339, %v2808_v37   ;;  %2390 = vpow2.f32 %v733_v44  ;;  %v751_v13 = vmul.f32 1.442695, %v720_v11 }
 0x2a4   :  { %770 = vperm.xlu0 %2337, %v2811_v47   ;;  %v2818_v40 = vpop.eup %2380  ;;  %2392 = vpow2.f32 %v739_v48 }
 0x2a5   :  { %v2820_v41 = vpop.eup %2382  ;;  %2394 = vpow2.f32 %v737_v49 }
 0x2a6   :  { %v2827_v45 = vpop.eup %2384  ;;  %2396 = vpow2.f32 %v745_v58 }
 0x2a7   :  { %v2829_v46 = vpop.eup %2386  ;;  %2398 = vpow2.f32 %v743_v60 }
 0x2a8   :  { %v2836_v0 = vpop.eup %2388  ;;  %2400 = vpow2.f32 %v749_v5 }
 0x2a9   :  { %v2838_v53 = vpop.eup %2390  ;;  %2402 = vpow2.f32 %v747_v9 }
 0x2aa   :  { %v2845_v63 = vpop.eup %2392  ;;  %2404 = vpow2.f32 %v751_v13 }
 0x2ab   :  { %779 = vperm.xlu1 %2339, %v2818_v40   ;;  %v2847_v2 = vpop.eup %2394 }
 0x2ac   :  { %776 = vperm.xlu0 %2337, %v2820_v41   ;;  %v2853_v8 = vpop.eup %2396 }
 0x2ad   :  { %v2855_v10 = vpop.eup %2398 }
 0x2ae   :  { %v2860_v16 = vpop.eup %2400 }
 0x2af   :  { %v2862_v15 = vpop.eup %2402 }
 0x2b0   :  { %v2866_v12 = vpop.eup %2404 }
 0x2b3   :  { %785 = vperm.xlu1 %2339, %v2827_v45  }
 0x2b4   :  { %782 = vperm.xlu0 %2337, %v2829_v46  }
 0x2bb   :  { %791 = vperm.xlu1 %2339, %v2836_v0  }
 0x2bc   :  { %788 = vperm.xlu0 %2337, %v2838_v53  }
 0x2c3   :  { %797 = vperm.xlu1 %2339, %v2845_v63  }
 0x2c4   :  { %794 = vperm.xlu0 %2337, %v2847_v2  }
 0x2cb   :  { %806 = vperm.xlu1 %2339, %v2853_v8  }
 0x2cc   :  { %803 = vperm.xlu0 %2337, %v2855_v10  }
 0x2d3   :  { %812 = vperm.xlu1 %2339, %v2860_v16  }
 0x2d4   :  { %809 = vperm.xlu0 %2337, %v2862_v15  }
 0x2dc   :  { %815 = vperm.xlu0 %2337, %v2866_v12  }
 0x2fc   :  { %v801_v25 = vpop.permute.xlu2 %800 }
 0x2fd   :  { %v832_v44 = vperm.slane %v801_v25, %v2758_v29 }
 0x315   :  { %v774_v18 = vpop.permute.xlu1 %773 }
 0x316   :  { %v771_v14 = vpop.permute.xlu0 %770  ;;  %v818_v36 = vperm.slane %v774_v18, %v2761_v31 }
 0x317   :  { %v817_v52 = vperm.slane %v771_v14, %v2758_v29 }
 0x319   :  { %v819_v57 = vsel %vm646_vm0, %v818_v36, %v817_v52 }
 0x31d   :  { %v780_v19 = vpop.permute.xlu1 %779 }
 0x31e   :  { %v777_v20 = vpop.permute.xlu0 %776  ;;  %v821_v32 = vperm.slane %v780_v19, %v2761_v31 }
 0x31f   :  { %v820_v33 = vperm.slane %v777_v20, %v2758_v29 }
 0x321   :  { %v822_v42 = vsel %vm646_vm0, %v821_v32, %v820_v33 }
 0x322   :  { %v841_v48 = vsel %vm669_vm1, %v822_v42, %v819_v57 }
 0x325   :  { %v786_v21 = vpop.permute.xlu1 %785 }
 0x326   :  { %v783_v17 = vpop.permute.xlu0 %782  ;;  %v824_v34 = vperm.slane %v786_v21, %v2761_v31 }
 0x327   :  { %v823_v35 = vperm.slane %v783_v17, %v2758_v29 }
 0x329   :  { %v825_v43 = vsel %vm646_vm0, %v824_v34, %v823_v35 }
 0x32a   :  { %v842_v4 = vsel %vm671_vm2, %v825_v43, %v841_v48 }
 0x32d   :  { %v792_v22 = vpop.permute.xlu1 %791 }
 0x32e   :  { %v789_v24 = vpop.permute.xlu0 %788  ;;  %v827_v55 = vperm.slane %v792_v22, %v2761_v31 }
 0x32f   :  { %v826_v51 = vperm.slane %v789_v24, %v2758_v29 }
 0x331   :  { %v828_v1 = vsel %vm646_vm0, %v827_v55, %v826_v51 }
 0x332   :  { %v843_v62 = vsel %vm673_vm3, %v828_v1, %v842_v4 }
 0x335   :  { %v798_v27 = vpop.permute.xlu1 %797 }
 0x336   :  { %v795_v26 = vpop.permute.xlu0 %794  ;;  %v830_v38 = vperm.slane %v798_v27, %v2761_v31 }
 0x337   :  { %v829_v39 = vperm.slane %v795_v26, %v2758_v29 }
 0x339   :  { %v831_v61 = vsel %vm646_vm0, %v830_v38, %v829_v39 }
 0x33a   :  { %v844_v7 = vsel %vm675_vm4, %v831_v61, %v843_v62 }
 0x33d   :  { %v807_v30 = vpop.permute.xlu1 %806 }
 0x33e   :  { %v804_v28 = vpop.permute.xlu0 %803  ;;  %v835_v49 = vperm.slane %v807_v30, %v2758_v29 }
 0x33f   :  { %v833_v59 = vperm.slane %v804_v28, %v2761_v31 }
 0x341   :  { %v834_v58 = vsel %vm646_vm0, %v833_v59, %v832_v44 }
 0x342   :  { %v845_v11 = vsel %vm677_vm5, %v834_v58, %v844_v7 }
 0x345   :  { %v813_v50 = vpop.permute.xlu1 %812 }
 0x346   :  { %v810_v54 = vpop.permute.xlu0 %809  ;;  %v838_v5 = vperm.slane %v813_v50, %v2758_v29 }
 0x347   :  { %v836_v56 = vperm.slane %v810_v54, %v2761_v31 }
 0x349   :  { %v837_v60 = vsel %vm646_vm0, %v836_v56, %v835_v49 }
 0x34a   :  { %v846_v18 = vsel %vm679_vm6, %v837_v60, %v845_v11 }
 0x34e   :  { %v816_v3 = vpop.permute.xlu0 %815 }
 0x34f   :  { %v839_v9 = vperm.slane %v816_v3, %v2761_v31 }
 0x351   :  { %v840_v13 = vsel %vm646_vm0, %v839_v9, %v838_v5 }
 0x352   :  { %v847_v14 = vsel %vm681_vm7, %v840_v13, %v846_v18 }
 0x353   :  { %v849_v19 = vsel %vm684_vm8, %v847_v14, 0.0 }
 0x354   :  { %850 = vadd.xlane.f32.xlu1 %v849_v19 }
 0x3c7   :  { %v2901_v20 = vpop.xlane.xlu1 %850 }
 0x3c8   :  { %v853_v21 = vperm.slane %v2901_v20, 0  ;;  %v854_v17 = vperm.slane %v2901_v20, 1  ;;  %v2906_v22 = vperm.slane %v2901_v20, 2  ;;  %v858_v24 = vperm.slane %v2901_v20, 5 }
 0x3c9   :  { %v2911_v27 = vperm.slane %v2901_v20, 3  ;;  %v2919_v39 = vperm.slane %v2901_v20, 4  ;;  %v2938_v14 = vperm.slane %v2901_v20, 6 }
 0x3ca   :  { %2406 = vrcp.f32 %v853_v21  ;;  %v878_v35 = vand.u32 2147483647, %v853_v21  ;;  %v880_v54 = vand.u32 2147483648, %v853_v21  ;;  %v958_v42 = vand.u32 2147483647, %v858_v24 }
 0x3cb   :  { %2408 = vrcp.f32 %v854_v17  ;;  %vm874_vm10 = vweird.f32 %v853_v21  ;;  %v960_v56 = vand.u32 2147483648, %v858_v24  ;;  %v896_v4 = vand.u32 2147483648, %v854_v17 }
 0x3cc   :  { %2410 = vrcp.f32 %v2906_v22  ;;  %vm879_vm12 = vcmp.eq.f32.partialorder %v878_v35, 8.507059e+37  ;;  %v881_v44 = vor.u32 1.1754944e-38, %v880_v54  ;;  %vm890_vm15 = vweird.f32 %v854_v17 }
 0x3cd   :  { %2412 = vrcp.f32 %v858_v24  ;;  %v894_v60 = vand.u32 2147483647, %v854_v17  ;;  %v961_v5 = vor.u32 1.1754944e-38, %v960_v56  ;;  %v897_v13 = vor.u32 1.1754944e-38, %v896_v4 }
 0x3ce   :  { %2414 = vrcp.f32 %v2911_v27 }
 0x3cf   :  { %2416 = vrcp.f32 %v2919_v39 }
 0x3d0   :  { %v2407_v26 = vpop.eup %2406  ;;  %2418 = vrcp.f32 %v2938_v14 }
 0x3d1   :  { %v2409_v28 = vpop.eup %2408  ;;  %v870_v30 = vmul.f32 %v2407_v26, %v853_v21  ;;  %vm875_vm9 = vweird.f32 %v2407_v26 }
 0x3d2   :  { %v2913_v32 = vpop.eup %2410  ;;  %v886_v33 = vmul.f32 %v2409_v28, %v854_v17  ;;  %vm876_vm11 = vmor %vm874_vm10, %vm875_vm9  ;;  %vm891_vm13 = vweird.f32 %v2409_v28  ;;  %vm954_vm9 = vweird.f32 %v858_v24 }
 0x3d3   :  { %v871_v34 = vsub.f32 1.0, %v870_v30  ;;  %v2413_v52 = vpop.eup %2412  ;;  %v902_v51 = vmul.f32 %v2913_v32, %v2906_v22  ;;  %vm2926_vm10 = vmor %vm890_vm15, %vm891_vm13  ;;  %vm895_vm13 = vcmp.eq.f32.partialorder %v894_v60, 8.507059e+37  ;;  %vm906_vm15 = vweird.f32 %v2906_v22 }
 0x3d4   :  { %v887_v36 = vsub.f32 1.0, %v886_v33  ;;  %v950_v25 = vmul.f32 %v2413_v52, %v858_v24  ;;  %v2921_v61 = vpop.eup %2414  ;;  %vm955_vm14 = vweird.f32 %v2413_v52 }
 0x3d5   :  { %v872_v55 = vmul.f32 %v2407_v26, %v871_v34  ;;  %v903_v48 = vsub.f32 1.0, %v902_v51  ;;  %v910_v34 = vand.u32 2147483647, %v2906_v22  ;;  %v928_v51 = vand.u32 2147483648, %v2911_v27 }
 0x3d6   :  { %v888_v38 = vmul.f32 %v2409_v28, %v887_v36  ;;  %v951_v43 = vsub.f32 1.0, %v950_v25 }
 0x3d7   :  { %v873_v59 = vadd.f32 %v2407_v26, %v872_v55 }
 0x3d8   :  { %v889_v1 = vadd.f32 %v2409_v28, %v888_v38  ;;  %v952_v49 = vmul.f32 %v2413_v52, %v951_v43  ;;  %v926_v38 = vand.u32 2147483647, %v2911_v27  ;;  %v929_v43 = vor.u32 1.1754944e-38, %v928_v51 }
 0x3d9   :  { %v877_v57 = vsel %vm876_vm11, %v2407_v26, %v873_v59  ;;  %vm956_vm11 = vmor %vm954_vm9, %vm955_vm14  ;;  %vm907_vm14 = vweird.f32 %v2913_v32  ;;  %v2417_v26 = vpop.eup %2416 }
 0x3da   :  { %v882_v50 = vsel %vm879_vm12, %v881_v44, %v877_v57  ;;  %v953_v3 = vadd.f32 %v2413_v52, %v952_v49  ;;  %v893_v9 = vsel %vm2926_vm10, %v2409_v28, %v889_v1  ;;  %vm959_vm12 = vcmp.eq.f32.partialorder %v958_v42, 8.507059e+37  ;;  %vm908_vm9 = vmor %vm906_vm15, %vm907_vm14  ;;  %v2419_v55 = vpop.eup %2418 }
 0x3db   :  { %v884_v58 = vmul.f32 %v2808_v37, %v882_v50  ;;  %v883_v62 = vmul.f32 %v2811_v47, %v882_v50  ;;  %v904_v37 = vmul.f32 %v2913_v32, %v903_v48  ;;  %v918_v47 = vmul.f32 %v2921_v61, %v2911_v27 }
 0x3dc   :  { %v957_v11 = vsel %vm956_vm11, %v2413_v52, %v953_v3  ;;  %v898_v21 = vsel %vm895_vm13, %v897_v13, %v893_v9  ;;  %v912_v28 = vand.u32 2147483648, %v2906_v22  ;;  %v934_v54 = vmul.f32 %v2417_v26, %v2919_v39 }
 0x3dd   :  { %1003 = vperm.xlu0 %2337, %v884_v58   ;;  %1000 = vperm.xlu2 %2338, %v883_v62   ;;  %v2935_v18 = vsel %vm959_vm12, %v961_v5, %v957_v11  ;;  %v905_v17 = vadd.f32 %v2913_v32, %v904_v37  ;;  %v919_v24 = vsub.f32 1.0, %v918_v47  ;;  %v900_v30 = vmul.f32 %v2818_v40, %v898_v21 }
 0x3de   :  { %v963_v19 = vmul.f32 %v2806_v6, %v2935_v18  ;;  %v899_v33 = vmul.f32 %v2820_v41, %v898_v21  ;;  %v913_v36 = vor.u32 1.1754944e-38, %v912_v28  ;;  %vm911_vm10 = vcmp.eq.f32.partialorder %v910_v34, 8.507059e+37 }
 0x3df   :  { %v909_v6 = vsel %vm908_vm9, %v2913_v32, %v905_v17  ;;  %v920_v35 = vmul.f32 %v2921_v61, %v919_v24  ;;  %v2954_v40 = vperm.slane %v2901_v20, 7  ;;  %vm923_vm11 = vweird.f32 %v2921_v61 }
 0x3e0   :  { %1165 = vperm.xlu1 %2339, %v963_v19   ;;  %v914_v41 = vsel %vm911_vm10, %v913_v36, %v909_v6  ;;  %v935_v22 = vsub.f32 1.0, %v934_v54  ;;  %vm922_vm12 = vweird.f32 %v2911_v27  ;;  %v966_v59 = vmul.f32 %v2419_v55, %v2938_v14  ;;  %v2433_v6 = vld [vmem:[#allocation2 + $0x40] sm:$0xff] }
 0x3e1   :  { %v921_v52 = vadd.f32 %v2921_v61, %v920_v35  ;;  %v916_v32 = vmul.f32 %v2827_v45, %v914_v41  ;;  %v915_v25 = vmul.f32 %v2829_v46, %v914_v41  ;;  %2420 = vrcp.f32 %v2954_v40  ;;  %vm924_vm13 = vmor %vm922_vm12, %vm923_vm11  ;;  %v2435_v41 = vld [vmem:[#allocation2 + $0x50] sm:$0xff] }
 0x3e2   :  { %v936_v42 = vmul.f32 %v2417_v26, %v935_v22  ;;  %vm927_vm14 = vcmp.eq.f32.partialorder %v926_v38, 8.507059e+37  ;;  %vm939_vm15 = vweird.f32 %v2417_v26  ;;  %v967_v46 = vsub.f32 1.0, %v966_v59  ;;  %v2437_v38 = vld [vmem:[#allocation2 + $0x60] sm:$0xff] }
 0x3e3   :  { %v925_v20 = vsel %vm924_vm13, %v2921_v61, %v921_v52  ;;  %v944_v57 = vand.u32 2147483648, %v2919_v39  ;;  %vm938_vm9 = vweird.f32 %v2919_v39  ;;  %v942_v48 = vand.u32 2147483647, %v2919_v39 }
 0x3e4   :  { %v930_v56 = vsel %vm927_vm14, %v929_v43, %v925_v20  ;;  %v937_v45 = vadd.f32 %v2417_v26, %v936_v42  ;;  %vm940_vm10 = vmor %vm938_vm9, %vm939_vm15  ;;  %v968_v49 = vmul.f32 %v2419_v55, %v967_v46  ;;  %vm971_vm12 = vweird.f32 %v2419_v55 }
 0x3e5   :  { %1036 = vperm.xlu0 %2337, %v900_v30   ;;  %1033 = vperm.xlu2 %2338, %v899_v33   ;;  %v932_v27 = vmul.f32 %v2836_v0, %v930_v56  ;;  %v931_v1 = vmul.f32 %v2838_v53, %v930_v56  ;;  %v945_v4 = vor.u32 1.1754944e-38, %v944_v57  ;;  %vm943_vm11 = vcmp.eq.f32.partialorder %v942_v48, 8.507059e+37  ;;  %v2439_v57 = vld [vmem:[#allocation2 + $0x70] sm:$0xff] }
 0x3e6   :  { %v941_v61 = vsel %vm940_vm10, %v2417_v26, %v937_v45  ;;  %v969_v62 = vadd.f32 %v2419_v55, %v968_v49  ;;  %v976_v0 = vand.u32 2147483648, %v2938_v14  ;;  %vm970_vm13 = vweird.f32 %v2938_v14  ;;  %v2438_v45 = vld [vmem:[#allocation2 + $0x78] sm:$0xff] }
 0x3e7   :  { %v2421_v44 = vpop.eup %2420  ;;  %v946_v58 = vsel %vm943_vm11, %v945_v4, %v941_v61  ;;  %v974_v39 = vand.u32 2147483647, %v2938_v14  ;;  %vm972_vm14 = vmor %vm970_vm13, %vm971_vm12  ;;  %v992_v11 = vand.u32 2147483648, %v2954_v40  ;;  %vm986_vm10 = vweird.f32 %v2954_v40 }
 0x3e8   :  { %v982_v50 = vmul.f32 %v2421_v44, %v2954_v40  ;;  %v948_v53 = vmul.f32 %v2845_v63, %v946_v58  ;;  %v947_v3 = vmul.f32 %v2847_v2, %v946_v58  ;;  %v973_v7 = vsel %vm972_vm14, %v2419_v55, %v969_v62 }
 0x3e9   :  { %v977_v9 = vor.u32 1.1754944e-38, %v976_v0  ;;  %vm975_vm15 = vcmp.eq.f32.partialorder %v974_v39, 8.507059e+37  ;;  %vm987_vm9 = vweird.f32 %v2421_v44  ;;  %v964_v2 = vmul.f32 %v2855_v10, %v2935_v18 }
 0x3ea   :  { %v983_v60 = vsub.f32 1.0, %v982_v50  ;;  %v990_v13 = vand.u32 2147483647, %v2954_v40  ;;  %vm988_vm11 = vmor %vm986_vm10, %vm987_vm9  ;;  %v993_v19 = vor.u32 1.1754944e-38, %v992_v11  ;;  %v2434_v40 = vld [vmem:[#allocation2 + $0x58] sm:$0xff] }
 0x3eb   :  { %v978_v37 = vsel %vm975_vm15, %v977_v9, %v973_v7  ;;  %v2082_v9 = vld [vmem:[%s3365_s9 + $0xa8] sm:$0xf] }
 0x3ec   :  { %v984_v5 = vmul.f32 %v2421_v44, %v983_v60  ;;  %v979_v63 = vmul.f32 %v2853_v8, %v978_v37  ;;  %vm991_vm12 = vcmp.eq.f32.partialorder %v990_v13, 8.507059e+37  ;;  %v980_v24 = vmul.f32 %v2862_v15, %v978_v37  ;;  %v2291_v37 = vld [vmem:[%s3365_s9 + $0xb0] sm:$0xf0] }
 0x3ed   :  { %1069 = vperm.xlu0 %2337, %v916_v32   ;;  %1066 = vperm.xlu2 %2338, %v915_v25   ;;  %v2436_v25 = vld [vmem:[#allocation2 + $0x68] sm:$0xff]  ;;  %v2083_v11 = vor.u32 %v2291_v37, %v2082_v9  ;;  %v2287_v13 = vld [vmem:[%s3365_s9 + $0x94] sm:$0xf] }
 0x3ee   :  { %v985_v47 = vadd.f32 %v2421_v44, %v984_v5  ;;  %v2267_v37 = vld [vmem:[#allocation6 + $0x50] sm:$0xf0] }
 0x3f0   :  { %v989_v14 = vsel %vm988_vm11, %v2421_v44, %v985_v47  ;;  %v2290_v47 = vld [vmem:[%s3365_s9 + $0xac] sm:$0xf] }
 0x3f1   :  { %v994_v21 = vsel %vm991_vm12, %v993_v19, %v989_v14  ;;  %v2072_v14 = vld [vmem:[%s3365_s9 + $0x9c] sm:$0xf0] }
 0x3f2   :  { %v995_v17 = vmul.f32 %v2860_v16, %v994_v21  ;;  %v996_v8 = vmul.f32 %v2866_v12, %v994_v21  ;;  %v2432_v16 = vld [vmem:[#allocation2 + $0x48] sm:$0xff]  ;;  %v2075_v21 = vor.u32 %v2287_v13, %v2072_v14  ;;  %v2277_v13 = vld [vmem:[%s3365_s9 + $0x40] sm:$0xf0] }
 0x3f5   :  { %1102 = vperm.xlu0 %2337, %v932_v27   ;;  %1099 = vperm.xlu2 %2338, %v931_v1  }
 0x3fd   :  { %1135 = vperm.xlu0 %2337, %v948_v53   ;;  %1132 = vperm.xlu2 %2338, %v947_v3  }
 0x405   :  { %1198 = vperm.xlu0 %2337, %v979_v63   ;;  %1168 = vperm.xlu2 %2338, %v964_v2   ;;  %v2288_v63 = vld [vmem:[%s3365_s9 + $0x98] sm:$0xf0] }
 0x40d   :  { %1231 = vperm.xlu0 %2337, %v995_v17   ;;  %1201 = vperm.xlu2 %2338, %v980_v24   ;;  %v2058_v17 = vld [vmem:[%s3365_s9 + $0x78] sm:$0xf]  ;;  %v2285_v24 = vld [vmem:[%s3365_s9 + $0x80] sm:$0xf0] }
 0x415   :  { %1234 = vperm.xlu2 %2338, %v996_v8   ;;  %v2284_v8 = vld [vmem:[%s3365_s9 + $0x7c] sm:$0xf] }
 0x437   :  { %v1001_v10 = vpop.permute.xlu2 %1000 }
 0x438   :  { %v1005_v30 = vperm.slane %v1001_v10, %v2758_v29  ;;  %v2059_v10 = vor.u32 %v2285_v24, %v2058_v17  ;;  %v2264_v17 = vld [vmem:[#allocation6 + $0x38] sm:$0xf0]  ;;  %v2263_v24 = vld [vmem:[#allocation6 + $0x34] sm:$0xf] }
 0x43f   :  { %v1034_v18 = vpop.permute.xlu2 %1033 }
 0x440   :  { %v1038_v12 = vperm.slane %v1034_v18, %v2758_v29  ;;  %v2060_v18 = vld [vmem:[%s3365_s9 + $0x84] sm:$0xf0] }
 0x447   :  { %v1067_v26 = vpop.permute.xlu2 %1066 }
 0x448   :  { %v1071_v55 = vperm.slane %v1067_v26, %v2758_v29  ;;  %v2090_v26 = vld [vmem:[%s3365_s9 + $0xb0] sm:$0xf] }
 0x44f   :  { %v1004_v28 = vpop.permute.xlu0 %1003  ;;  %v1100_v15 = vpop.permute.xlu2 %1099 }
 0x450   :  { %v1006_v33 = vperm.slane %v1004_v28, %v2761_v31  ;;  %v1104_v42 = vperm.slane %v1100_v15, %v2758_v29  ;;  %v2292_v28 = vld [vmem:[%s3365_s9 + $0xb8] sm:$0xf0]  ;;  %v2281_v15 = vld [vmem:[%s3365_s9 + $0x64] sm:$0xf] }
 0x452   :  { %v1007_v34 = vsel %vm646_vm0, %v1006_v33, %v1005_v30  ;;  %v1166_v46 = vpop.permute.xlu1 %1165  ;;  %v2063_v30 = vor.u32 %v2284_v8, %v2060_v18  ;;  %v2091_v33 = vor.u32 %v2292_v28, %v2090_v26  ;;  %v2120_v18 = vld [vmem:[#allocation6 + $0x3c] sm:$0xf0]  ;;  %v2274_v28 = vld [vmem:[%s3365_s9 + $0x28] sm:$0xf0] }
 0x453   :  { %1988 = vmatmul.msk.f32.vlgmr.msra.gmra.mxu2 %vm684_vm8, %v1007_v34  ;;  %v1170_v1 = vperm.slane %v1166_v46, %v2758_v29  ;;  %v2046_v34 = vld [vmem:[%s3365_s9 + $0x60] sm:$0xf]  ;;  %v2054_v46 = vld [vmem:[%s3365_s9 + $0x68] sm:$0xf] }
 0x454   :  { %1156 = vmatpush.msra.mxu2 %v2432_v16  ;;  %v2282_v16 = vld [vmem:[%s3365_s9 + $0x68] sm:$0xf0]  ;;  %1504 = vmatpush.bf16.msrb.mxu0 %v2091_v33  ;;  %v2018_v26 = vld [vmem:[%s3365_s9 + $0x20] sm:$0xf] }
 0x455   :  { %v2019_v33 = vor.u32 %v2274_v28, %v2018_v26 }
 0x456   :  { %1157 = vmatpush.msra.mxu2 %v2433_v6  ;;  %v2047_v6 = vor.u32 %v2282_v16, %v2046_v34  ;;  %v2106_v34 = vld [vmem:[#allocation6 + $0x18] sm:$0xf]  ;;  %v2261_v16 = vld [vmem:[#allocation6 + $0x20] sm:$0xf0] }
 0x457   :  { %v1037_v35 = vpop.permute.xlu0 %1036  ;;  %v1133_v52 = vpop.permute.xlu2 %1132 }
 0x458   :  { %v1039_v54 = vperm.slane %v1037_v35, %v2761_v31  ;;  %v1137_v48 = vperm.slane %v1133_v52, %v2758_v29  ;;  %v2048_v35 = vld [vmem:[%s3365_s9 + $0x6c] sm:$0xf0]  ;;  %v2279_v52 = vld [vmem:[%s3365_s9 + $0x50] sm:$0xf0] }
 0x45a   :  { %v1040_v36 = vsel %vm646_vm0, %v1039_v54, %v1038_v12  ;;  %v2078_v12 = vld [vmem:[%s3365_s9 + $0x98] sm:$0xf]  ;;  %v2289_v54 = vld [vmem:[%s3365_s9 + $0xa0] sm:$0xf0] }
 0x45b   :  { %1989 = vmatmul.msk.f32.vlgmr.msra.gmra.mxu3 %vm684_vm8, %v1040_v36  ;;  %v2051_v36 = vor.u32 %v2281_v15, %v2048_v35  ;;  %v2260_v15 = vld [vmem:[#allocation6 + $0x1c] sm:$0xf]  ;;  %v2006_v35 = vld [vmem:[%s3365_s9 + $0x8] sm:$0xf] }
 0x45c   :  { %1189 = vmatpush.msra.mxu3 %v2434_v40  ;;  %v2079_v40 = vor.u32 %v2289_v54, %v2078_v12  ;;  %v2271_v12 = vld [vmem:[%s3365_s9 + $0x10] sm:$0xf0] }
 0x45e   :  { %1190 = vmatpush.msra.mxu3 %v2435_v41  ;;  %1505 = vmatpush.bf16.msrb.mxu0 %v2079_v40  ;;  %v2034_v41 = vld [vmem:[%s3365_s9 + $0x48] sm:$0xf]  ;;  %v2138_v40 = vld [vmem:[#allocation6 + $0x50] sm:$0xf] }
 0x45f   :  { %v1070_v22 = vpop.permute.xlu0 %1069  ;;  %v1169_v43 = vpop.permute.xlu2 %1168 }
 0x460   :  { %v1072_v51 = vperm.slane %v1070_v22, %v2761_v31  ;;  %v1171_v44 = vperm.slane %v1169_v43, %v2761_v31  ;;  %v2278_v22 = vld [vmem:[%s3365_s9 + $0x4c] sm:$0xf] }
 0x462   :  { %v1073_v32 = vsel %vm646_vm0, %v1072_v51, %v1071_v55  ;;  %v1172_v49 = vsel %vm646_vm0, %v1171_v44, %v1170_v1  ;;  %v2035_v55 = vor.u32 %v2279_v52, %v2034_v41  ;;  %v2036_v51 = vld [vmem:[%s3365_s9 + $0x54] sm:$0xf0]  ;;  %v2007_v52 = vor.u32 %v2271_v12, %v2006_v35 }
 0x463   :  { %1990 = vmatmul.msk.f32.vlgmr.msrb.gmra.mxu2 %vm684_vm8, %v1073_v32  ;;  %v2066_v32 = vld [vmem:[%s3365_s9 + $0x80] sm:$0xf]  ;;  %v2010_v1 = vld [vmem:[%s3365_s9 + $0x18] sm:$0xf] }
 0x464   :  { %1222 = vmatpush.msrb.mxu2 %v2436_v25  ;;  %v2039_v25 = vor.u32 %v2278_v22, %v2036_v51  ;;  %v2094_v22 = vld [vmem:[#allocation6] sm:$0xf]  ;;  %v2268_v51 = vld [vmem:[#allocation6 + $0x58] sm:$0xf0] }
 0x466   :  { %1223 = vmatpush.msrb.mxu2 %v2437_v38  ;;  %v2286_v38 = vld [vmem:[%s3365_s9 + $0x88] sm:$0xf0] }
 0x467   :  { %v1103_v20 = vpop.permute.xlu0 %1102  ;;  %v1202_v4 = vpop.permute.xlu2 %1201 }
 0x468   :  { %v1105_v59 = vperm.slane %v1103_v20, %v2761_v31  ;;  %v1204_v62 = vperm.slane %v1202_v4, %v2761_v31  ;;  %v2022_v20 = vld [vmem:[%s3365_s9 + $0x30] sm:$0xf]  ;;  %v2012_v4 = vld [vmem:[%s3365_s9 + $0x24] sm:$0xf0] }
 0x46a   :  { %v1106_v56 = vsel %vm646_vm0, %v1105_v59, %v1104_v42  ;;  %v2276_v42 = vld [vmem:[%s3365_s9 + $0x38] sm:$0xf0]  ;;  %v2067_v59 = vor.u32 %v2286_v38, %v2066_v32  ;;  %v2257_v32 = vld [vmem:[#allocation6 + $0x4] sm:$0xf]  ;;  %v2139_v38 = vor.u32 %v2268_v51, %v2138_v40  ;;  %v2314_v51 = vld [vmem:[%s3366_s10 + $0xac] sm:$0xf] }
 0x46b   :  { %1991 = vmatmul.msk.f32.vlgmr.msrb.gmra.mxu3 %vm684_vm8, %v1106_v56  ;;  %v2023_v43 = vor.u32 %v2276_v42, %v2022_v20  ;;  %v2275_v56 = vld [vmem:[%s3365_s9 + $0x34] sm:$0xf]  ;;  %v2126_v20 = vld [vmem:[#allocation6 + $0x38] sm:$0xf]  ;;  %v2265_v42 = vld [vmem:[#allocation6 + $0x40] sm:$0xf0] }
 0x46c   :  { %1255 = vmatpush.msrb.mxu3 %v2438_v45  ;;  %v2024_v45 = vld [vmem:[%s3365_s9 + $0x3c] sm:$0xf0]  ;;  %1506 = vmatpush.bf16.msrb.mxu0 %v2067_v59 }
 0x46d   :  { %v2027_v44 = vor.u32 %v2275_v56, %v2024_v45 }
 0x46e   :  { %1256 = vmatpush.msrb.mxu3 %v2439_v57  ;;  %v2283_v57 = vld [vmem:[%s3365_s9 + $0x70] sm:$0xf0] }
 0x46f   :  { %v1136_v27 = vpop.permute.xlu0 %1135  ;;  %v1235_v53 = vpop.permute.xlu2 %1234 }
 0x470   :  { %v1138_v61 = vperm.slane %v1136_v27, %v2761_v31  ;;  %v1237_v39 = vperm.slane %v1235_v53, %v2761_v31  ;;  %v2070_v31 = vld [vmem:[%s3365_s9 + $0x90] sm:$0xf]  ;;  %v2055_v27 = vor.u32 %v2283_v57, %v2054_v46  ;;  %v1998_v53 = vld [vmem:[%s3365_s9] sm:$0xf]  ;;  %v2127_v46 = vor.u32 %v2265_v42, %v2126_v20 }
 0x471   :  { %v2071_v19 = vor.u32 %v2288_v63, %v2070_v31  ;;  %v2114_v57 = vld [vmem:[#allocation6 + $0x20] sm:$0xf]  ;;  %v2217_v42 = vld [vmem:[%s3366_s10 + $0x90] sm:$0xf] }
 0x472   :  { %v1139_v50 = vsel %vm646_vm0, %v1138_v61, %v1137_v48  ;;  %v2273_v48 = vld [vmem:[%s3365_s9 + $0x20] sm:$0xf0]  ;;  %v2272_v61 = vld [vmem:[%s3365_s9 + $0x1c] sm:$0xf]  ;;  %1507 = vmatpush.bf16.msrb.mxu0 %v2055_v27  ;;  %v2262_v27 = vld [vmem:[#allocation6 + $0x28] sm:$0xf0] }
 0x473   :  { %1992 = vmatmul.msk.f32.vlgmr.msra.gmra.mxu2 %vm684_vm8, %v1139_v50  ;;  %1993 = vmatmul.msk.f32.vlgmr.msra.gmra.mxu3 %vm684_vm8, %v1172_v49  ;;  %v2011_v50 = vor.u32 %v2273_v48, %v2010_v1 }
 0x474   :  { %1478 = vmatpush.bf16.msra.mxu2 %v2083_v11  ;;  %v2132_v11 = vld [vmem:[#allocation6 + $0x54] sm:$0xf0] }
 0x477   :  { %v1199_v58 = vpop.permute.xlu0 %1198 }
 0x478   :  { %v1203_v60 = vperm.slane %v1199_v58, %v2758_v29  ;;  %1479 = vmatpush.bf16.msra.mxu2 %v2071_v19  ;;  %v2042_v58 = vld [vmem:[%s3365_s9 + $0x50] sm:$0xf] }
 0x47a   :  { %v1205_v0 = vsel %vm646_vm0, %v1204_v62, %v1203_v60  ;;  %v2280_v62 = vld [vmem:[%s3365_s9 + $0x58] sm:$0xf0]  ;;  %v2015_v60 = vor.u32 %v2272_v61, %v2012_v4  ;;  %v2115_v4 = vor.u32 %v2262_v27, %v2114_v57  ;;  %v2219_v57 = vld [vmem:[%s3366_s10 + $0x9c] sm:$0xf0] }
 0x47b   :  { %1994 = vmatmul.msk.f32.vlgmr.msrb.gmra.mxu2 %vm684_vm8, %v1205_v0  ;;  %v2043_v0 = vor.u32 %v2280_v62, %v2042_v58 }
 0x47c   :  { %1480 = vmatpush.bf16.msra.mxu2 %v2059_v10 }
 0x47d   :  { %1508 = vmatpush.bf16.msrb.mxu0 %v2043_v0  ;;  %v2102_v0 = vld [vmem:[#allocation6 + $0x8] sm:$0xf] }
 0x47f   :  { %v1232_v3 = vpop.permute.xlu0 %1231 }
 0x480   :  { %v1236_v7 = vperm.slane %v1232_v3, %v2758_v29  ;;  %v2084_v29 = vld [vmem:[%s3365_s9 + $0xb4] sm:$0xf0]  ;;  %1481 = vmatpush.bf16.msra.mxu2 %v2047_v6  ;;  %v2270_v3 = vld [vmem:[%s3365_s9 + $0x8] sm:$0xf0]  ;;  %v2108_v6 = vld [vmem:[#allocation6 + $0x24] sm:$0xf0] }
 0x481   :  { %v2087_v2 = vor.u32 %v2290_v47, %v2084_v29  ;;  %v1999_v9 = vor.u32 %v2270_v3, %v1998_v53  ;;  %v2266_v47 = vld [vmem:[#allocation6 + $0x4c] sm:$0xf]  ;;  %v2111_v41 = vor.u32 %v2260_v15, %v2108_v6  ;;  %v2259_v53 = vld [vmem:[#allocation6 + $0x10] sm:$0xf0] }
 0x482   :  { %v1238_v5 = vsel %vm646_vm0, %v1237_v39, %v1236_v7  ;;  %v2269_v39 = vld [vmem:[%s3365_s9 + $0x4] sm:$0xf]  ;;  %v2000_v7 = vld [vmem:[%s3365_s9 + $0xc] sm:$0xf0]  ;;  %v2135_v14 = vor.u32 %v2266_v47, %v2132_v11  ;;  %vm1581_vm0 = vcmask 523264  }
 0x483   :  { %1995 = vmatmul.msk.f32.vlgmr.msrb.gmra.mxu3 %vm684_vm8, %v1238_v5  ;;  %v2130_v5 = vld [vmem:[#allocation6 + $0x48] sm:$0xf]  ;;  %v2003_v31 = vor.u32 %v2269_v39, %v2000_v7 }
 0x484   :  { %1491 = vmatpush.bf16.msra.mxu3 %v2087_v2  ;;  %1482 = vmatpush.bf16.msra.mxu2 %v2035_v55  ;;  %v2131_v63 = vor.u32 %v2267_v37, %v2130_v5  ;;  %v2030_v2 = vld [vmem:[%s3365_s9 + $0x38] sm:$0xf]  ;;  %v2258_v55 = vld [vmem:[#allocation6 + $0x8] sm:$0xf0] }
 0x485   :  { %v2031_v19 = vor.u32 %v2277_v13, %v2030_v2 }
 0x487   :  { %1509 = vmatpush.bf16.msrb.mxu0 %v2031_v19 }
 0x488   :  { %1492 = vmatpush.bf16.msra.mxu3 %v2075_v21  ;;  %1483 = vmatpush.bf16.msra.mxu2 %v2023_v43  ;;  %v2118_v21 = vld [vmem:[#allocation6 + $0x30] sm:$0xf]  ;;  %v2095_v43 = vor.u32 %v2258_v55, %v2094_v22 }
 0x489   :  { %v2119_v10 = vor.u32 %v2264_v17, %v2118_v21 }
 0x48b   :  { %1510 = vmatpush.bf16.msrb.mxu0 %v2019_v33 }
 0x48c   :  { %1493 = vmatpush.bf16.msra.mxu3 %v2063_v30  ;;  %1484 = vmatpush.bf16.msra.mxu2 %v2011_v50  ;;  %v2123_v30 = vor.u32 %v2263_v24, %v2120_v18 }
 0x48f   :  { %1511 = vmatpush.bf16.msrb.mxu0 %v2007_v52  ;;  %v2315_v52 = vld [vmem:[%s3366_s10 + $0xb0] sm:$0xf0] }
 0x490   :  { %1494 = vmatpush.bf16.msra.mxu3 %v2051_v36  ;;  %1485 = vmatpush.bf16.msra.mxu2 %v1999_v9  ;;  %v2107_v36 = vor.u32 %v2261_v16, %v2106_v34 }
 0x493   :  { %1615 = vmatpush.bf16.msra.mxu0 %v2139_v38 }
 0x494   :  { %1495 = vmatpush.bf16.msra.mxu3 %v2039_v25  ;;  %1589 = vmatpush.bf16.msrb.mxu2 %v2131_v63  ;;  %v2096_v25 = vld [vmem:[#allocation6 + $0xc] sm:$0xf0]  ;;  %v2103_v63 = vor.u32 %v2259_v53, %v2102_v0  ;;  %v2207_v0 = vld [vmem:[%s3366_s10 + $0x84] sm:$0xf0]  ;;  %v2213_v53 = vld [vmem:[%s3366_s10 + $0x80] sm:$0xf] }
 0x495   :  { %v2099_v45 = vor.u32 %v2257_v32, %v2096_v25  ;;  %v2231_v32 = vld [vmem:[%s3366_s10 + $0xb4] sm:$0xf0] }
 0x497   :  { %1616 = vmatpush.bf16.msra.mxu0 %v2127_v46  ;;  %v2316_v46 = vld [vmem:[%s3366_s10 + $0xb8] sm:$0xf0] }
 0x498   :  { %1496 = vmatpush.bf16.msra.mxu3 %v2027_v44  ;;  %1590 = vmatpush.bf16.msrb.mxu2 %v2119_v10 }
 0x49b   :  { %1617 = vmatpush.bf16.msra.mxu0 %v2115_v4  ;;  %v2205_v4 = vld [vmem:[%s3366_s10 + $0x78] sm:$0xf] }
 0x49c   :  { %1497 = vmatpush.bf16.msra.mxu3 %v2015_v60  ;;  %1591 = vmatpush.bf16.msrb.mxu2 %v2107_v36 }
 0x49f   :  { %1618 = vmatpush.bf16.msra.mxu0 %v2103_v63  ;;  %v2307_v63 = vld [vmem:[%s3366_s10 + $0x70] sm:$0xf0] }
 0x4a0   :  { %1498 = vmatpush.bf16.msra.mxu3 %v2003_v31  ;;  %1592 = vmatpush.bf16.msrb.mxu2 %v2095_v43  ;;  %v2234_v43 = vor.u32 %v2314_v51, %v2231_v32 }
 0x4a4   :  { %1602 = vmatpush.bf16.msrb.mxu3 %v2135_v14 }
 0x4a8   :  { %1603 = vmatpush.bf16.msrb.mxu3 %v2123_v30 }
 0x4ac   :  { %1604 = vmatpush.bf16.msrb.mxu3 %v2111_v41  ;;  %v2229_v41 = vld [vmem:[%s3366_s10 + $0xa8] sm:$0xf] }
 0x4ad   :  { %v2230_v20 = vor.u32 %v2315_v52, %v2229_v41  ;;  %v2159_v52 = vld [vmem:[%s3366_s10 + $0x24] sm:$0xf0] }
 0x4b0   :  { %1605 = vmatpush.bf16.msrb.mxu3 %v2099_v45  ;;  %v2237_v45 = vld [vmem:[%s3366_s10 + $0xb0] sm:$0xf] }
 0x4b1   :  { %v2238_v27 = vor.u32 %v2316_v46, %v2237_v45 }
 0x4d6   :  { %v3123_v49 = vpop.f32.mrf.mxu2 }
 0x4d7   :  { %v1278_v58 = vpack.c.bf16 %v3123_v49, %v3123_v49 }
 0x4d9   :  { %v1326_v2 = vunpack.c.l.b16 %v1278_v58  ;;  %v2309_v58 = vld [vmem:[%s3366_s10 + $0x80] sm:$0xf0] }
 0x4de   :  { %v3146_v29 = vpop.f32.mrf.mxu3 }
 0x4df   :  { %v1279_v56 = vpack.c.bf16 %v3146_v29, %v3146_v29  ;;  %v1897_v62 = vrot.slane %v3146_v29, 7 }
 0x4e1   :  { %v1327_v48 = vunpack.c.l.b16 %v1279_v56  ;;  %v1898_v13 = vsel %vm669_vm1, %v1897_v62, %v3123_v49  ;;  %v2312_v56 = vld [vmem:[%s3366_s10 + $0x98] sm:$0xf0] }
 0x4e2   :  { %v2308_v62 = vld [vmem:[%s3366_s10 + $0x7c] sm:$0xf] }
 0x4e3   :  { %v1334_v5 = vrot.slane %v1327_v48, 7  ;;  %v2225_v48 = vld [vmem:[%s3366_s10 + $0x98] sm:$0xf] }
 0x4e5   :  { %v1335_v21 = vsel %vm669_vm1, %v1334_v5, %v1326_v2  ;;  %v2193_v5 = vld [vmem:[%s3366_s10 + $0x60] sm:$0xf] }
 0x4e6   :  { %v3154_v8 = vpop.f32.mrf.mxu2 }
 0x4e7   :  { %v1280_v44 = vpack.c.bf16 %v3154_v8, %v3154_v8  ;;  %v1899_v3 = vrot.slane %v3154_v8, 6 }
 0x4e9   :  { %v1328_v60 = vunpack.c.l.b16 %v1280_v44  ;;  %v1900_v14 = vsel %vm671_vm2, %v1899_v3, %v1898_v13  ;;  %v2311_v44 = vld [vmem:[%s3366_s10 + $0x94] sm:$0xf]  ;;  %v2310_v3 = vld [vmem:[%s3366_s10 + $0x88] sm:$0xf0]  ;;  %v94_v13 = vld [vmem:[%s3356_s0] sm:$0xff] }
 0x4eb   :  { %v1336_v29 = vrot.slane %v1328_v60, 6 }
 0x4ed   :  { %v1337_v30 = vsel %vm671_vm2, %v1336_v29, %v1335_v21  ;;  %v2302_v21 = vld [vmem:[%s3366_s10 + $0x4c] sm:$0xf] }
 0x4ee   :  { %v1126_v54 = vpop.f32.mrf.mxu3 }
 0x4ef   :  { %v1281_v1 = vpack.c.bf16 %v1126_v54, %v1126_v54  ;;  %v1901_v9 = vrot.slane %v1126_v54, 5 }
 0x4f1   :  { %v1329_v39 = vunpack.c.l.b16 %v1281_v1  ;;  %v1902_v17 = vsel %vm673_vm3, %v1901_v9, %v1900_v14  ;;  %v2218_v1 = vor.u32 %v2312_v56, %v2217_v42  ;;  %v2306_v9 = vld [vmem:[%s3366_s10 + $0x68] sm:$0xf0]  ;;  %v2181_v14 = vld [vmem:[%s3366_s10 + $0x48] sm:$0xf]  ;;  %v2295_v56 = vld [vmem:[%s3366_s10 + $0x10] sm:$0xf0] }
 0x4f2   :  { %v2194_v2 = vor.u32 %v2306_v9, %v2193_v5 }
 0x4f3   :  { %v1338_v19 = vrot.slane %v1329_v39, 5  ;;  %v2206_v39 = vor.u32 %v2309_v58, %v2205_v4 }
 0x4f5   :  { %v1339_v49 = vsel %vm673_vm3, %v1338_v19, %v1337_v30  ;;  %v2303_v19 = vld [vmem:[%s3366_s10 + $0x50] sm:$0xf0]  ;;  %v2169_v30 = vld [vmem:[%s3366_s10 + $0x30] sm:$0xf] }
 0x4f6   :  { %v1159_v59 = vpop.f32.mrf.mxu2  ;;  %v1192_v50 = vpop.f32.mrf.mxu3 }
 0x4f7   :  { %v1282_v61 = vpack.c.bf16 %v1159_v59, %v1159_v59  ;;  %v1283_v37 = vpack.c.bf16 %v1192_v50, %v1192_v50  ;;  %v1903_v11 = vrot.slane %v1159_v59, 4  ;;  %v1905_v8 = vrot.slane %v1192_v50, 3 }
 0x4f8   :  { %v2222_v50 = vor.u32 %v2311_v44, %v2219_v57 }
 0x4f9   :  { %v1330_v47 = vunpack.c.l.b16 %v1282_v61  ;;  %v1331_v24 = vunpack.c.l.b16 %v1283_v37  ;;  %v1904_v18 = vsel %vm675_vm4, %v1903_v11, %v1902_v17  ;;  %v2313_v61 = vld [vmem:[%s3366_s10 + $0xa0] sm:$0xf0]  ;;  %v2195_v11 = vld [vmem:[%s3366_s10 + $0x6c] sm:$0xf0] }
 0x4fa   :  { %v1906_v16 = vsel %vm677_vm5, %v1905_v8, %v1904_v18  ;;  %v2226_v60 = vor.u32 %v2313_v61, %v2225_v48  ;;  %v2305_v37 = vld [vmem:[%s3366_s10 + $0x64] sm:$0xf]  ;;  %v2189_v8 = vld [vmem:[%s3366_s10 + $0x50] sm:$0xf]  ;;  %v1261_v18 = vpack.c.bf16 %v94_v13, %v94_v13 }
 0x4fb   :  { %v1340_v10 = vrot.slane %v1330_v47, 4  ;;  %v1342_v34 = vrot.slane %v1331_v24, 3  ;;  %v2214_v47 = vor.u32 %v2310_v3, %v2213_v53  ;;  %v2198_v29 = vor.u32 %v2305_v37, %v2195_v11  ;;  %v2183_v24 = vld [vmem:[%s3366_s10 + $0x54] sm:$0xf0]  ;;  %v1667_v3 = vld [vmem:[%s3368_s12] sm:$0x7] }
 0x4fc   :  { %v1669_v9 = vperm.slane %v1667_v3, 0  ;;  %v1670_v11 = vperm.slane %v1667_v3, 1 }
 0x4fd   :  { %v1341_v35 = vsel %vm675_vm4, %v1340_v10, %v1339_v49  ;;  %v2304_v10 = vld [vmem:[%s3366_s10 + $0x58] sm:$0xf0] }
 0x4fe   :  { %v1225_v7 = vpop.f32.mrf.mxu2  ;;  %v1343_v22 = vsel %vm677_vm5, %v1342_v34, %v1341_v35  ;;  %v2300_v49 = vld [vmem:[%s3366_s10 + $0x38] sm:$0xf0]  ;;  %v2190_v34 = vor.u32 %v2304_v10, %v2189_v8 }
 0x4ff   :  { %v1284_v31 = vpack.c.bf16 %v1225_v7, %v1225_v7  ;;  %v1907_v28 = vrot.slane %v1225_v7, 2  ;;  %v2210_v7 = vor.u32 %v2308_v62, %v2207_v0  ;;  %v2170_v35 = vor.u32 %v2300_v49, %v2169_v30 }
 0x501   :  { %v1332_v26 = vunpack.c.l.b16 %v1284_v31  ;;  %v1908_v54 = vsel %vm679_vm6, %v1907_v28, %v1906_v16  ;;  %v2201_v31 = vld [vmem:[%s3366_s10 + $0x68] sm:$0xf]  ;;  %v2186_v28 = vor.u32 %v2302_v21, %v2183_v24  ;;  %v2171_v16 = vld [vmem:[%s3366_s10 + $0x3c] sm:$0xf0] }
 0x502   :  { %v2202_v17 = vor.u32 %v2307_v63, %v2201_v31 }
 0x503   :  { %v1344_v12 = vrot.slane %v1332_v26, 2  ;;  %v2182_v26 = vor.u32 %v2303_v19, %v2181_v14 }
 0x505   :  { %v1345_v25 = vsel %vm679_vm6, %v1344_v12, %v1343_v22  ;;  %v2165_v22 = vld [vmem:[%s3366_s10 + $0x20] sm:$0xf] }
 0x506   :  { %v1258_v33 = vpop.f32.mrf.mxu3 }
 0x507   :  { %v1285_v15 = vpack.c.bf16 %v1258_v33, %v1258_v33  ;;  %v1909_v6 = vrot.slane %v1258_v33, 1  ;;  %v2299_v33 = vld [vmem:[%s3366_s10 + $0x34] sm:$0xf] }
 0x508   :  { %v2174_v12 = vor.u32 %v2299_v33, %v2171_v16 }
 0x509   :  { %v1333_v36 = vunpack.c.l.b16 %v1285_v15  ;;  %v1910_v40 = vsel %vm681_vm7, %v1909_v6, %v1908_v54  ;;  %v2177_v15 = vld [vmem:[%s3366_s10 + $0x38] sm:$0xf]  ;;  %v2301_v6 = vld [vmem:[%s3366_s10 + $0x40] sm:$0xf0] }
 0x50a   :  { %1912 = vst [vmem:[%s3369_s13] sm:$0xff] %v1910_v40  ;;  %v2157_v54 = vld [vmem:[%s3366_s10 + $0x18] sm:$0xf]  ;;  %v2296_v40 = vld [vmem:[%s3366_s10 + $0x1c] sm:$0xf]  ;;  %v2178_v41 = vor.u32 %v2301_v6, %v2177_v15  ;;  %v1671_v6 = vperm.slane %v1667_v3, 2 }
 0x50b   :  { %v1346_v55 = vrot.slane %v1333_v36, 1  ;;  %v2297_v36 = vld [vmem:[%s3366_s10 + $0x20] sm:$0xf0]  ;;  %v2162_v32 = vor.u32 %v2296_v40, %v2159_v52 }
 0x50c   :  { %v2158_v51 = vor.u32 %v2297_v36, %v2157_v54 }
 0x50d   :  { %v1347_v38 = vsel %vm681_vm7, %v1346_v55, %v1345_v25  ;;  %v2298_v55 = vld [vmem:[%s3366_s10 + $0x28] sm:$0xf0]  ;;  %v2145_v25 = vld [vmem:[%s3366_s10] sm:$0xf] }
 0x50e   :  { %v1348_v59 = vpack.c.b16 %v1347_v38, %v1347_v38  ;;  %v2294_v38 = vld [vmem:[%s3366_s10 + $0x8] sm:$0xf0]  ;;  %v2166_v42 = vor.u32 %v2298_v55, %v2165_v22 }
 0x50f   :  { %v2146_v45 = vor.u32 %v2294_v38, %v2145_v25 }
 0x510   :  { %1486 = vmatmul.bf16.vlgmr.msra.gmra.mxu2 %v1348_v59  ;;  %1499 = vmatmul.bf16.vlgmr.msra.gmra.mxu3 %v1348_v59 }
 0x511   :  { %1512 = vmatmul.bf16.vlgmr.msrb.gmra.mxu0 %v1348_v59  ;;  %1803 = vmatpush.bf16.msra.mxu2 %v2230_v20  ;;  %v2293_v20 = vld [vmem:[%s3366_s10 + $0x4] sm:$0xf]  ;;  %v2147_v59 = vld [vmem:[%s3366_s10 + $0xc] sm:$0xf0] }
 0x512   :  { %1816 = vmatpush.bf16.msra.mxu3 %v2234_v43  ;;  %1829 = vmatpush.bf16.msrb.mxu0 %v2238_v27  ;;  %v2153_v43 = vld [vmem:[%s3366_s10 + $0x8] sm:$0xf]  ;;  %v2150_v46 = vor.u32 %v2293_v20, %v2147_v59 }
 0x513   :  { %v2154_v44 = vor.u32 %v2295_v56, %v2153_v43 }
 0x515   :  { %1804 = vmatpush.bf16.msra.mxu2 %v2218_v1 }
 0x516   :  { %1817 = vmatpush.bf16.msra.mxu3 %v2222_v50  ;;  %1830 = vmatpush.bf16.msrb.mxu0 %v2226_v60 }
 0x519   :  { %1805 = vmatpush.bf16.msra.mxu2 %v2206_v39 }
 0x51a   :  { %1818 = vmatpush.bf16.msra.mxu3 %v2210_v7  ;;  %1831 = vmatpush.bf16.msrb.mxu0 %v2214_v47 }
 0x51d   :  { %1806 = vmatpush.bf16.msra.mxu2 %v2194_v2 }
 0x51e   :  { %1819 = vmatpush.bf16.msra.mxu3 %v2198_v29  ;;  %1832 = vmatpush.bf16.msrb.mxu0 %v2202_v17 }
 0x520   :  { %2140 = vmatmul.msk.bf16.vlgmr.msrb.gmra.mxu2 %vm1581_vm0, %v1261_v18  ;;  %2141 = vmatmul.msk.bf16.vlgmr.msrb.gmra.mxu3 %vm1581_vm0, %v1261_v18 }
 0x521   :  { %2142 = vmatmul.msk.bf16.vlgmr.msra.gmra.mxu0 %vm1581_vm0, %v1261_v18  ;;  %1807 = vmatpush.bf16.msra.mxu2 %v2182_v26 }
 0x522   :  { %1820 = vmatpush.bf16.msra.mxu3 %v2186_v28  ;;  %1833 = vmatpush.bf16.msrb.mxu0 %v2190_v34 }
 0x525   :  { %1808 = vmatpush.bf16.msra.mxu2 %v2170_v35 }
 0x526   :  { %1821 = vmatpush.bf16.msra.mxu3 %v2174_v12  ;;  %1834 = vmatpush.bf16.msrb.mxu0 %v2178_v41 }
 0x529   :  { %1809 = vmatpush.bf16.msra.mxu2 %v2158_v51 }
 0x52a   :  { %1822 = vmatpush.bf16.msra.mxu3 %v2162_v32  ;;  %1835 = vmatpush.bf16.msrb.mxu0 %v2166_v42 }
 0x52d   :  { %1810 = vmatpush.bf16.msra.mxu2 %v2146_v45 }
 0x52e   :  { %1823 = vmatpush.bf16.msra.mxu3 %v2150_v46  ;;  %1836 = vmatpush.bf16.msrb.mxu0 %v2154_v44 }
 0x530   :  { %1811 = vmatmul.bf16.vlgmr.msra.gmra.mxu2 %v2638_v23 }
 0x531   :  { %1824 = vmatmul.bf16.vlgmr.msra.gmra.mxu3 %v2638_v23  ;;  %1837 = vmatmul.bf16.vlgmr.msrb.gmra.mxu0 %v2638_v23  ;;  %v1624_v23 = vld [vmem:[%s3367_s11] sm:$0x7] }
 0x532   :  { %v1626_v5 = vperm.slane %v1624_v23, 0  ;;  %v1627_v47 = vperm.slane %v1624_v23, 1  ;;  %v1628_v41 = vperm.slane %v1624_v23, 2 }
 0x58e   :  { %v1513_v57 = vpop.f32.mrf.mxu0 }
 0x593   :  { %v1487_v27 = vpop.f32.mrf.mxu2  ;;  %v1500_v1 = vpop.f32.mrf.mxu3 }
 0x596   :  { %v1515_v48 = vpop.f32.mrf.mxu0 }
 0x59b   :  { %v1489_v61 = vpop.f32.mrf.mxu2  ;;  %v1502_v50 = vpop.f32.mrf.mxu3 }
 0x59c   :  { %v2440_v61 = vld [vmem:[%s3357_s1] sm:$0xff] }
 0x59e   :  { %v1620_v4 = vpop.f32.mrf.mxu0 }
 0x59f   :  { %v1621_v22 = vadd.f32 %v1620_v4, %v1513_v57 }
 0x5a1   :  { %v1634_v42 = vadd.f32 %v1628_v41, %v1621_v22 }
 0x5a3   :  { %v1594_v58 = vpop.f32.mrf.mxu2  ;;  %v1607_v62 = vpop.f32.mrf.mxu3 }
 0x5a4   :  { %v1595_v7 = vadd.f32 %v1594_v58, %v1487_v27  ;;  %v1608_v37 = vadd.f32 %v1607_v62, %v1500_v1 }
 0x5a6   :  { %v1622_v60 = vpop.f32.mrf.mxu0  ;;  %v1632_v63 = vadd.f32 %v1626_v5, %v1595_v7  ;;  %v1633_v29 = vadd.f32 %v1627_v47, %v1608_v37 }
 0x5ab   :  { %v1596_v0 = vpop.f32.mrf.mxu2  ;;  %v1609_v53 = vpop.f32.mrf.mxu3 }
 0x5ae   :  { %v1838_v39 = vpop.f32.mrf.mxu0 }
 0x5af   :  { %v1839_v55 = vadd.f32 %v1838_v39, %v1671_v6 }
 0x5b3   :  { %v1812_v31 = vpop.f32.mrf.mxu2 }
 0x5b4   :  { %v1813_v2 = vadd.f32 %v1812_v31, %v1669_v9  ;;  %v1825_v13 = vpop.f32.mrf.mxu3 }
 0x5b5   :  { %v1826_v14 = vadd.f32 %v1825_v13, %v1670_v11 }
 0x5b6   :  { %v1842_v19 = vadd.f32 %v1813_v2, %v1632_v63  ;;  %v1840_v17 = vpop.f32.mrf.mxu0 }
 0x5b7   :  { %v1862_v21 = vadd.f32 %v1826_v14, %v1633_v29 }
 0x5b8   :  { %v2239_v24 = vmul.f32 -1.442695, %v1842_v19 }
 0x5b9   :  { %v2240_v8 = vmul.f32 -1.442695, %v1862_v21 }
 0x5ba   :  { %2422 = vpow2.f32 %v2239_v24 }
 0x5bb   :  { %2424 = vpow2.f32 %v2240_v8  ;;  %v1814_v10 = vpop.f32.mrf.mxu2 }
 0x5bc   :  { %v1827_v18 = vpop.f32.mrf.mxu3 }
 0x5c0   :  { %v2423_v26 = vpop.eup %2422 }
 0x5c1   :  { %v2425_v28 = vpop.eup %2424  ;;  %v1846_v30 = vadd.f32 1.0, %v2423_v26 }
 0x5c2   :  { %v1866_v49 = vadd.f32 1.0, %v2425_v28 }
 0x5c3   :  { %2426 = vrcp.f32 %v1846_v30  ;;  %v1858_v54 = vand.u32 2147483648, %v1846_v30  ;;  %v1856_v40 = vand.u32 2147483647, %v1846_v30  ;;  %vm1852_vm2 = vweird.f32 %v1846_v30 }
 0x5c4   :  { %2428 = vrcp.f32 %v1866_v49  ;;  %v1878_v59 = vand.u32 2147483648, %v1866_v49  ;;  %vm1872_vm6 = vweird.f32 %v1866_v49  ;;  %v1876_v56 = vand.u32 2147483647, %v1866_v49 }
 0x5c5   :  { %v1859_v32 = vor.u32 1.1754944e-38, %v1858_v54  ;;  %vm1857_vm4 = vcmp.eq.f32.partialorder %v1856_v40, 8.507059e+37 }
 0x5c6   :  { %v1879_v44 = vor.u32 1.1754944e-38, %v1878_v59  ;;  %vm1877_vm8 = vcmp.eq.f32.partialorder %v1876_v56, 8.507059e+37 }
 0x5c9   :  { %v2427_v33 = vpop.eup %2426 }
 0x5ca   :  { %v2429_v34 = vpop.eup %2428  ;;  %v1848_v16 = vmul.f32 %v2427_v33, %v1846_v30  ;;  %vm1853_vm1 = vweird.f32 %v2427_v33 }
 0x5cb   :  { %v1868_v15 = vmul.f32 %v2429_v34, %v1866_v49  ;;  %vm1854_vm3 = vmor %vm1852_vm2, %vm1853_vm1  ;;  %vm1873_vm5 = vweird.f32 %v2429_v34 }
 0x5cc   :  { %v1849_v35 = vsub.f32 1.0, %v1848_v16  ;;  %vm1874_vm7 = vmor %vm1872_vm6, %vm1873_vm5 }
 0x5cd   :  { %v1869_v12 = vsub.f32 1.0, %v1868_v15 }
 0x5ce   :  { %v1850_v36 = vmul.f32 %v2427_v33, %v1849_v35 }
 0x5cf   :  { %v1870_v52 = vmul.f32 %v2429_v34, %v1869_v12 }
 0x5d0   :  { %v1851_v51 = vadd.f32 %v2427_v33, %v1850_v36 }
 0x5d1   :  { %v1871_v20 = vadd.f32 %v2429_v34, %v1870_v52 }
 0x5d2   :  { %v1855_v25 = vsel %vm1854_vm3, %v2427_v33, %v1851_v51 }
 0x5d3   :  { %v1860_v38 = vsel %vm1857_vm4, %v1859_v32, %v1855_v25  ;;  %v1875_v46 = vsel %vm1874_vm7, %v2429_v34, %v1871_v20 }
 0x5d4   :  { %v1882_v43 = vmul.f32 %v1860_v38, %v1839_v55  ;;  %v1880_v57 = vsel %vm1877_vm8, %v1879_v44, %v1875_v46 }
 0x5d5   :  { %v1885_v27 = vsub.f32 1.0, %v1880_v57  ;;  %v1887_v50 = vmul.f32 %v2440_v61, %v1880_v57 }
 0x5d6   :  { %v1883_v45 = vadd.f32 %v1882_v43, %v1634_v42 }
 0x5d8   :  { %2430 = vtanh.f32 %v1883_v45 }
 0x5de   :  { %v2431_v1 = vpop.eup %2430 }
 0x5df   :  { %v1886_v48 = vmul.f32 %v2431_v1, %v1885_v27 }
 0x5e1   :  { %v1888_v4 = vadd.f32 %v1887_v50, %v1886_v48 }
 0x5e3   :  { %1913 = vst [vmem:[%s3370_s14] sm:$0xff] %v1888_v4 }
 0x5e4   :  { %1922 = vsyncpa [#allocation3], 1 }
 0x5e5   :  { %1923 = vsyncpa [#allocation5], 1 }

</bundles_post_ra>
